<compile_context>
chip_gen: v7x
topology: tpu7x:2x2x1
jax: 0.10.0
libtpu: 0.0.40
codegen_flags: <defaults>
</compile_context>

<pallas_src>
import functools
import math

import jax
import jax.numpy as jnp
from jax.experimental import pallas as pl
from jax.experimental.pallas import tpu as pltpu

_SUBLANE = 8


def _sine_layer_kernel(x_ref, w_ref, b_ref, o_ref, *, matmul_dtype):
    # Cast the x tile in VMEM (no-op when matmul_dtype == x dtype).
    x = x_ref[...].astype(matmul_dtype)
    # MXU matmul, f32 accumulation.
    z = jnp.dot(x, w_ref[...], preferred_element_type=jnp.float32)
    # Bias add + sin in f32 on the VPU (omega_0 already folded into w/b).
    z = z + b_ref[...]
    o_ref[...] = jnp.sin(z).astype(o_ref.dtype)


def prepare_sine_layer_params(weight_t, bias, omega_0=30.0,
                              matmul_dtype=jnp.bfloat16):
    """Fold omega_0 into the parameters (sin(w0*(xW+b)) == sin(x(w0*W)+w0*b)),
    cast W to the MXU operand dtype, reshape bias for broadcasting.
    Call once per parameter update — not on every forward."""
    w = (weight_t.astype(jnp.float32) * omega_0).astype(matmul_dtype)
    b = (bias.astype(jnp.float32) * omega_0).reshape(1, -1)  # stays f32
    return w, b


def _pick_block_rows(B, F_in, F_out, x_dtype, w_dtype, out_dtype,
                     requested, budget_bytes):
    """Largest batch tile <= requested whose double-buffered working set fits
    the (conservative, generation-safe) VMEM budget."""
    if B <= requested:
        return B  # single block equal to the full batch dim — always legal
    tb = max(_SUBLANE, (requested // _SUBLANE) * _SUBLANE)

    def plan_bytes(t):
        return (2 * t * F_in * jnp.dtype(x_dtype).itemsize        # x (dbl-buf)
                + 2 * t * F_out * jnp.dtype(out_dtype).itemsize   # out (dbl-buf)
                + t * F_out * 4                                   # f32 z tile
                + F_in * F_out * jnp.dtype(w_dtype).itemsize      # resident W
                + F_out * 4)                                      # resident b

    while tb > _SUBLANE and plan_bytes(tb) > budget_bytes:
        tb = max(_SUBLANE, ((tb // 2) // _SUBLANE) * _SUBLANE)
    return tb


def sine_layer(x, w_prepared, b_prepared, *, block_rows=512,
               out_dtype=jnp.float32,
               vmem_budget_bytes=20 * 1024 * 1024):
    """SIREN sine layer forward.

    x:          (B, F_in) float
    w_prepared: (F_in, F_out)  = omega_0 * W^T, in the MXU operand dtype
    b_prepared: (1, F_out)     = omega_0 * b, float32
    returns     (B, F_out) = sin(x @ w_prepared + b_prepared)
    """
    B, F_in = x.shape
    F_in_w, F_out = w_prepared.shape
    assert F_in == F_in_w, (F_in, F_in_w)
    matmul_dtype = w_prepared.dtype

    TB = _pick_block_rows(B, F_in, F_out, x.dtype, matmul_dtype, out_dtype,
                          block_rows, vmem_budget_bytes)
    grid = (pl.cdiv(B, TB),)  # partial last tile handled by masked stores

    kernel = functools.partial(_sine_layer_kernel, matmul_dtype=matmul_dtype)

    return pl.pallas_call(
        kernel,
        out_shape=jax.ShapeDtypeStruct((B, F_out), out_dtype),
        grid_spec=pltpu.PrefetchScalarGridSpec(
            num_scalar_prefetch=0,
            grid=grid,
            in_specs=[
                # streaming x tile (double-buffered by the pipeline)
                pl.BlockSpec((TB, F_in), lambda i: (i, 0)),
                # weight & bias: same block every step -> VMEM-resident
                pl.BlockSpec((F_in, F_out), lambda i: (0, 0)),
                pl.BlockSpec((1, F_out), lambda i: (0, 0)),
            ],
            out_specs=pl.BlockSpec((TB, F_out), lambda i: (i, 0)),
        ),
        compiler_params=pltpu.CompilerParams(
            # batch axis is embarrassingly parallel (no-op on 1-TC chips).
            dimension_semantics=("parallel",),
            # 32 MiB scoped VMEM: >= our tile plan budget, valid on all gens.
            vmem_limit_bytes=32 * 1024 * 1024,
        ),
    )(x, w_prepared, b_prepared)


def init_sine_layer_params(key, in_features, out_features,
                           is_first=False, omega_0=30.0):
    """SIREN init matching SineLayer.init_weights + PyTorch Linear default
    bias init. Weight returned pre-transposed: (in_features, out_features)."""
    kw, kb = jax.random.split(key)
    if is_first:
        bound_w = 1.0 / in_features
    else:
        bound_w = math.sqrt(6.0 / in_features) / omega_0
    weight_t = jax.random.uniform(
        kw, (in_features, out_features), jnp.float32,
        minval=-bound_w, maxval=bound_w)
    bound_b = 1.0 / math.sqrt(in_features)
    bias = jax.random.uniform(
        kb, (out_features,), jnp.float32, minval=-bound_b, maxval=bound_b)
    return weight_t, bias


if __name__ == "__main__":
    key = jax.random.PRNGKey(0)
    k_in, k_params = jax.random.split(key)

    # Small shapes consistent with the module; B=300 exercises the
    # cdiv grid + masked partial last tile when block_rows < B.
    batch = 300
    in_features = 16
    out_features = 32
    omega_0 = 30.0
    is_first = True

    x = jax.random.normal(k_in, (batch, in_features), jnp.float32)
    weight_t, bias = init_sine_layer_params(
        k_params, in_features, out_features, is_first=is_first,
        omega_0=omega_0)

    # Reference in plain JAX (exactly the PyTorch forward's math).
    y_ref = jnp.sin(omega_0 * (x @ weight_t + bias[None, :]))

    # ---- f32-operand path, small tile -> multi-step grid + partial tile ----
    w32, b32 = prepare_sine_layer_params(weight_t, bias, omega_0,
                                         matmul_dtype=jnp.float32)
    y32 = jax.block_until_ready(sine_layer(x, w32, b32, block_rows=128))
    assert y32.shape == (batch, out_features) and y32.dtype == jnp.float32
    assert jnp.allclose(y32, y_ref, atol=1e-4, rtol=1e-4), (
        float(jnp.max(jnp.abs(y32 - y_ref))))

    # ---- default bf16-MXU path (in-kernel x cast), default tile ------------
    wbf, bbf = prepare_sine_layer_params(weight_t, bias, omega_0)
    ybf = jax.block_until_ready(sine_layer(x, wbf, bbf))
    assert ybf.shape == (batch, out_features)
    assert jnp.allclose(ybf, y_ref, atol=0.25), (
        float(jnp.max(jnp.abs(ybf - y_ref))))

    # ---- bf16 output writeback (for chaining into a bf16 next layer) -------
    ybo = jax.block_until_ready(sine_layer(x, wbf, bbf,
                                           out_dtype=jnp.bfloat16))
    assert ybo.shape == (batch, out_features) and ybo.dtype == jnp.bfloat16
    assert jnp.allclose(ybo.astype(jnp.float32), y_ref, atol=0.25), (
        float(jnp.max(jnp.abs(ybo.astype(jnp.float32) - y_ref))))

    print("KERNEL_OK")
</pallas_src>

<mosaic_0001>
module attributes {stable_mosaic.version = 11 : i64} {
  func.func @_sine_layer_kernel(%arg0: i32, %arg1: memref<128x16xf32, #tpu.memory_space<vmem>>, %arg2: memref<16x32xf32, #tpu.memory_space<vmem>>, %arg3: memref<1x32xf32, #tpu.memory_space<vmem>>, %arg4: memref<128x32xf32, #tpu.memory_space<vmem>>) attributes {dimension_semantics = [#tpu.dimension_semantics<parallel>], iteration_bounds = array<i64: 3>, scalar_prefetch = 0 : i64, scratch_operands = 0 : i64, tpu.core_type = #tpu.core_type<tc>, window_params = [{transform_indices = @transform_0, window_bounds = array<i64: 128, 16>}, {pipeline_mode = #tpu.pipeline_mode<synchronous>, transform_indices = @transform_1, window_bounds = array<i64: 16, 32>}, {pipeline_mode = #tpu.pipeline_mode<synchronous>, transform_indices = @transform_2, window_bounds = array<i64: 1, 32>}, {transform_indices = @transform_3, window_bounds = array<i64: 128, 32>}]} {
    %c0 = arith.constant 0 : index
    %c0_0 = arith.constant 0 : index
    %0 = vector.load %arg1[%c0, %c0_0] : memref<128x16xf32, #tpu.memory_space<vmem>>, vector<128x16xf32>
    %c0_1 = arith.constant 0 : index
    %c0_2 = arith.constant 0 : index
    %1 = vector.load %arg2[%c0_1, %c0_2] : memref<16x32xf32, #tpu.memory_space<vmem>>, vector<16x32xf32>
    %cst = arith.constant dense<0.000000e+00> : vector<128x32xf32>
    %2 = tpu.matmul %0, %1, %cst {dimension_numbers = #tpu.dot_dimension_numbers<[1], [0], [0], [1], [0, 0, 1, 1], [], []>} : vector<128x16xf32>, vector<16x32xf32>, vector<128x32xf32> -> vector<128x32xf32>
    %c0_3 = arith.constant 0 : index
    %c0_4 = arith.constant 0 : index
    %3 = vector.load %arg3[%c0_3, %c0_4] : memref<1x32xf32, #tpu.memory_space<vmem>>, vector<1x32xf32>
    %4 = vector.broadcast %3 : vector<1x32xf32> to vector<128x32xf32>
    %5 = arith.addf %2, %4 : vector<128x32xf32>
    %6 = math.sin %5 : vector<128x32xf32>
    %c0_5 = arith.constant 0 : index
    %c0_6 = arith.constant 0 : index
    %7 = vector.load %arg4[%c0_5, %c0_6] : memref<128x32xf32, #tpu.memory_space<vmem>>, vector<128x32xf32>
    tpu.vector_store %arg4[%c0_5, %c0_6], %6 {strides = array<i32>} : memref<128x32xf32, #tpu.memory_space<vmem>>, vector<128x32xf32>,
    return
  }
  func.func @transform_0(%arg0: i32) -> (i32, i32) {
    %c0_i32 = arith.constant 0 : i32
    %c0_i32_0 = arith.constant 0 : i32
    return %arg0, %c0_i32 : i32, i32
  }
  func.func @transform_1(%arg0: i32) -> (i32, i32) {
    %c0_i32 = arith.constant 0 : i32
    %c0_i32_0 = arith.constant 0 : i32
    %c0_i32_1 = arith.constant 0 : i32
    return %c0_i32, %c0_i32_0 : i32, i32
  }
  func.func @transform_2(%arg0: i32) -> (i32, i32) {
    %c0_i32 = arith.constant 0 : i32
    %c0_i32_0 = arith.constant 0 : i32
    %c0_i32_1 = arith.constant 0 : i32
    return %c0_i32, %c0_i32_0 : i32, i32
  }
  func.func @transform_3(%arg0: i32) -> (i32, i32) {
    %c0_i32 = arith.constant 0 : i32
    %c0_i32_0 = arith.constant 0 : i32
    return %arg0, %c0_i32 : i32, i32
  }
}

</mosaic_0001>

<bundles_post_ra>
// kernel: tpu_custom_call.1
= control target key start
LH: loop header
LB: loop body
LE: loop exit
PB: predicated region body
PF: predicated region fallthrough
CT: control target
= control target key end

     0   :  { %s2865_s12 = smov 0   ;;  %s2867_s13 = smov 0   ;;  %s4361_s0 = inlined_call_operand.vmem [shape: f32[300,16], index: 0, kind: input, shape index: {}]   ;;  %s4362_s1 = inlined_call_operand.vmem [shape: f32[16,32], index: 1, kind: input, shape index: {}]   ;;  %s4363_s2 = inlined_call_operand.vmem [shape: f32[1,32], index: 2, kind: input, shape index: {}]   ;;  %s4364_s3 = inlined_call_operand.vmem [shape: f32[300,32], index: 3, kind: output, shape index: {}]  }
   0x1   :  { %s2869_s14 = smov 0  }
   0x2 LB: > { %s2878_s15 = sadd.s32 4294967295, %s2805_s14   ;;  %s2880_s16 = sadd.s32 1, %s2805_s14   ;;  %s2805_s14 = sphi %s2869_s14, %s4399_s14   ;;  %s2801_s13 = sphi %s2867_s13, %s4398_s13   ;;  %s2797_s12 = sphi %s2865_s12, %s4397_s12  }
   0x3   : > { %s85_s17 = ssub.s32 %s2805_s14, %s2880_s16  ;;  %s88_s18 = sadd.s32 1, %s2801_s13 }
   0x4   : > { %p86_p0 = scmp.eq.s32.totalorder %s85_s17, 0  ;;  %p98_p1 = scmp.ne.s32.totalorder %s2801_s13, %s2797_s12 }
   0x5   : > { %p99_p2 = scmp.eq.s32.totalorder %s2878_s15, 2  ;;  %p2370_p3 = scmp.ge.s32.totalorder %s2805_s14, 1 }
   0x6   : > { %s2888_s19 = scalar_select %p86_p0, %s2801_s13, %s88_s18  }
   0x7   : > { %p2890_p4 = por %p99_p2, %p98_p1  ;;  %p146_p5 = scmp.lt.s32.totalorder %s2805_s14, 4 }
   0x9   : > { %p147_p6 = pnand %p2370_p3, %p146_p5 }
   0xa   : > { %v208_v0 = vld [vmem:[%s4362_s1] sm:$0xff] (!%p147_p6)  ;;  %v209_v1 = vld [vmem:[%s4362_s1 + $0x8] sm:$0xff] (!%p147_p6)  ;;  %s2901_s25 = sshll.u32 (!%p147_p6), %s2878_s15, 4  ;;  %vm217_vm0 = vcmask (!%p147_p6), 130048   ;;  %v2839_v60 = vmov (!%p147_p6), 683565275  }
   0xb   : > { %150 = sbr.rel (%p147_p6) target bundleno = 719 (0x2cf), region = 32  ;;  %v2521_v2 = vpack.c.bf16 (!%p147_p6), %v209_v1, %v208_v0  ;;  %p178_p7 = scmp.lt.s32.totalorder (!%p147_p6), %s2901_s25, 37  ;;  %v2927_v19 = vld [vmem:[%s4363_s2] ss:$0 sm:$0xff] (!%p147_p6)  ;;  %v2840_v0 = vmov (!%p147_p6), 2475754826  }
   0xc   : > { %s170_s6 = sand.u32 (!%p147_p6), 1, %s2797_s12  }
   0xd   : > { %2522 = vmatprep.subr.bf16.mxu0 (!%p147_p6), %v2521_v2  ;;  %2525 = vmatprep.subr.bf16.mxu1 (!%p147_p6), %v2521_v2  ;;  %s2371_s7 = sshll.u32 (!%p147_p6), %s170_s6, 7 }
   0xe   : > { %2524 = vmatpush3.bf16.msra.mxu0 (!%p147_p6), %v2521_v2  ;;  %2526 = vmatpush3.bf16.msra.mxu1 (!%p147_p6), %v2521_v2  ;;  %v2841_v2 = vmov (!%p147_p6), 2131351028   ;;  %s3243_s8 = scalar_lea.vmem (!%p147_p6), [#allocation2], %s2371_s7  }
  0x12   : > { %s179_s26 = scalar_select %p178_p7, %s2901_s25, 37 }
  0x13   : > { %s2100_s14 = ssub.s32 (%p2890_p4), 38, %s2901_s25  ;;  %s2472_s17 = sshll.u32 (%p2890_p4), %s2878_s15, 7 }
  0x14   : > { %s2373_s27 = sshll.u32 %s179_s26, 3  ;;  %p2101_p8 = scmp.lt.s32.totalorder (%p2890_p4), %s2100_s14, 16 }
  0x15   : > { %s181_s30 = scalar_lea.vmem %s4361_s0, %s2373_s27  ;;  %s4268_s22 = scalar_lea.vmem (%p2890_p4), %s4364_s3, %s2472_s17  }
  0x16   : > { %v192_v3 = vld [vmem:[%s181_s30] sm:$0xff]  ;;  %v193_v5 = vld [vmem:[%s181_s30 + $0x8] sm:$0xff]  ;;  %v194_v7 = vld [vmem:[%s181_s30 + $0x10] sm:$0xff] }
  0x17   : > { %v200_v4 = vld [vmem:[%s181_s30 + $0x40] sm:$0xff]  ;;  %2497 = vmatprep.mubr.msk.f32.mxu0 %vm217_vm0, %v192_v3  ;;  %v201_v6 = vld [vmem:[%s181_s30 + $0x48] sm:$0xff]  ;;  %v202_v8 = vld [vmem:[%s181_s30 + $0x50] sm:$0xff] }
  0x18   : > { %2509 = vmatprep.mubr.msk.f32.mxu1 %vm217_vm0, %v200_v4  ;;  %2498 = vmatmul.mubr.msk.f32.vlgmr.msra.gmra.mrb[0].mxu0 %vm217_vm0, %v193_v5  ;;  %v195_v9 = vld [vmem:[%s181_s30 + $0x18] sm:$0xff]  ;;  %v196_v11 = vld [vmem:[%s181_s30 + $0x20] sm:$0xff]  ;;  %v197_v13 = vld [vmem:[%s181_s30 + $0x28] sm:$0xff]  ;;  %v2842_v4 = vmov 2102212464  }
  0x19   : > { %2510 = vmatmul.mubr.msk.f32.vlgmr.msra.gmra.mrb[0].mxu1 %vm217_vm0, %v201_v6  ;;  %2500 = vmatprep.mubr.msk.f32.mxu0 %vm217_vm0, %v194_v7  ;;  %v203_v10 = vld [vmem:[%s181_s30 + $0x58] sm:$0xff]  ;;  %v204_v12 = vld [vmem:[%s181_s30 + $0x60] sm:$0xff]  ;;  %v205_v14 = vld [vmem:[%s181_s30 + $0x68] sm:$0xff]  ;;  %v2843_v6 = vmov 920167782  }
  0x1a   : > { %2512 = vmatprep.mubr.msk.f32.mxu1 %vm217_vm0, %v202_v8  ;;  %v198_v15 = vld [vmem:[%s181_s30 + $0x30] sm:$0xff]  ;;  %v199_v17 = vld [vmem:[%s181_s30 + $0x38] sm:$0xff] }
  0x1b   : > { %v206_v16 = vld [vmem:[%s181_s30 + $0x70] sm:$0xff]  ;;  %v207_v18 = vld [vmem:[%s181_s30 + $0x78] sm:$0xff] }
  0x1c   : > { %2501 = vmatmul.mubr.msk.f32.gmra.mrb[2].mxu0 %vm217_vm0, %v195_v9 }
  0x1d   : > { %2513 = vmatmul.mubr.msk.f32.gmra.mrb[2].mxu1 %vm217_vm0, %v203_v10  ;;  %2503 = vmatprep.mubr.msk.f32.mxu0 %vm217_vm0, %v196_v11 }
  0x1e   : > { %2515 = vmatprep.mubr.msk.f32.mxu1 %vm217_vm0, %v204_v12 }
  0x20   : > { %2504 = vmatmul.mubr.msk.f32.gmra.mrb[4].mxu0 %vm217_vm0, %v197_v13  ;;  %v2844_v13 = vmov 1326507024  }
  0x21   : > { %2516 = vmatmul.mubr.msk.f32.gmra.mrb[4].mxu1 %vm217_vm0, %v205_v14  ;;  %2506 = vmatprep.mubr.msk.f32.mxu0 %vm217_vm0, %v198_v15 }
  0x22   : > { %2518 = vmatprep.mubr.msk.f32.mxu1 %vm217_vm0, %v206_v16 }
  0x24   : > { %2507 = vmatmul.mubr.msk.f32.gmra.mrb[6].mxu0 %vm217_vm0, %v199_v17 }
  0x25   : > { %2519 = vmatmul.mubr.msk.f32.gmra.mrb[6].mxu1 %vm217_vm0, %v207_v18 }
  0xeb   : > { %v2499_v20 = vpop.f32.mrb[0].mxu0 }
  0xec   : > { %v2511_v21 = vpop.f32.mrb[0].mxu1  ;;  %v2930_v22 = vadd.f32 %v2499_v20, %v2927_v19  ;;  %v332_v24 = vpop.f32.mrb[1].mxu0 }
  0xed   : > { %v2933_v23 = vadd.f32 %v2511_v21, %v2927_v19  ;;  %v372_v25 = vpop.f32.mrb[1].mxu1  ;;  %v2936_v26 = vadd.f32 %v2927_v19, %v332_v24 }
  0xee   : > { %v515_v27 = vand.u32 2147483647, %v2930_v22  ;;  %v518_v28 = vand.u32 2139095040, %v2930_v22  ;;  %v2954_v44 = vadd.f32 %v2927_v19, %v372_v25  ;;  %vm517_vm14 = vcmp.lt.s32.totalorder %v2930_v22, 0 }
  0xef   : > { %v1347_v29 = vand.u32 2147483647, %v2933_v23  ;;  %v1350_v30 = vand.u32 2139095040, %v2933_v23  ;;  %v2942_v31 = vpop.f32.mrb[2].mxu0  ;;  %v414_v37 = vand.u32 2139095040, %v2936_v26 }
  0xf0   : > { %v2944_v32 = vpop.f32.mrb[2].mxu1  ;;  %v519_v33 = vshrl.u32 %v518_v28, 23  ;;  %v522_v34 = vand.u32 8388607, %v515_v27  ;;  %v2951_v39 = vpop.f32.mrb[3].mxu0  ;;  %v1246_v58 = vand.u32 2139095040, %v2954_v44 }
  0xf1   : > { %v1351_v35 = vshrl.u32 %v1350_v30, 23  ;;  %v1354_v36 = vand.u32 8388607, %v1347_v29  ;;  %v415_v41 = vshrl.u32 %v414_v37, 23  ;;  %v411_v47 = vand.u32 2147483647, %v2936_v26 }
  0xf2   : > { %v2395_v38 = vadd.s32 4294967169, %v519_v33  ;;  %v523_v42 = vor.u32 8388608, %v522_v34  ;;  %v2957_v49 = vpop.f32.mrb[3].mxu1  ;;  %vm3057_vm15 = vcmp.le.f32.partialorder %v515_v27, 0.7853982 }
  0xf3   : > { %v2427_v40 = vadd.s32 4294967169, %v1351_v35  ;;  %v1355_v45 = vor.u32 8388608, %v1354_v36  ;;  %v2391_v48 = vadd.s32 4294967169, %v415_v41  ;;  %v2965_v56 = vand.u32 8388607, %v411_v47 }
  0xf4   : > { %v525_v43 = vadd.s32 1, %v2395_v38  ;;  %v2959_v53 = vshll.u32 %v523_v42, 8 }
  0xf5   : > { %v1357_v46 = vadd.s32 1, %v2427_v40  ;;  %v2961_v55 = vshll.u32 %v1355_v45, 8  ;;  %v2967_v57 = vadd.s32 1, %v2391_v48 }
  0xf6   : > { %vm526_vm1 = vcmp.gt.s32.totalorder %v525_v43, 0 }
  0xf7   : > { %v527_v50 = vsel %vm526_vm1, %v525_v43, 0  ;;  %vm1358_vm2 = vcmp.gt.s32.totalorder %v1357_v46, 0  ;;  %vm422_vm7 = vcmp.gt.s32.totalorder %v2967_v57, 0 }
  0xf8   : > { %v528_v51 = vshrl.u32 %v527_v50, 5  ;;  %v529_v52 = vand.u32 31, %v527_v50  ;;  %v1359_v54 = vsel %vm1358_vm2, %v1357_v46, 0 }
  0xf9   : > { %v2971_v62 = vshrl.u32 %v1359_v54, 5  ;;  %v1361_v63 = vand.u32 31, %v1359_v54 }
  0xfa   : > { %v530_v59 = vsub.s32 32, %v529_v52  ;;  %v532_v61 = vshll.u32 %v2839_v60, %v529_v52  ;;  %v535_v1 = vshll.u32 %v2840_v0, %v529_v52  ;;  %v538_v3 = vshll.u32 %v2841_v2, %v529_v52 }
  0xfb   : > { %v541_v5 = vshll.u32 %v2842_v4, %v529_v52  ;;  %v544_v7 = vshll.u32 %v2843_v6, %v529_v52  ;;  %vm547_vm3 = vcmp.lt.s32.totalorder %v528_v51, 1  ;;  %vm548_vm4 = vcmp.lt.s32.totalorder %v528_v51, 2 }
  0xfc   : > { %v533_v8 = vshrl.u32 %v2840_v0, %v530_v59  ;;  %v536_v9 = vshrl.u32 %v2841_v2, %v530_v59  ;;  %v539_v10 = vshrl.u32 %v2842_v4, %v530_v59  ;;  %v531_v11 = vshrl.u32 %v2839_v60, %v530_v59 }
  0xfd   : > { %v542_v12 = vshrl.u32 %v2843_v6, %v530_v59  ;;  %v545_v14 = vshrl.u32 %v2844_v13, %v530_v59  ;;  %v1362_v18 = vsub.s32 32, %v1361_v63  ;;  %vm549_vm5 = vcmp.lt.s32.totalorder %v528_v51, 3 }
  0xfe   : > { %v534_v15 = vor.u32 %v533_v8, %v532_v61  ;;  %v537_v16 = vor.u32 %v536_v9, %v535_v1  ;;  %v540_v17 = vor.u32 %v539_v10, %v538_v3  ;;  %vm550_vm6 = vcmp.lt.s32.totalorder %v528_v51, 4 }
  0xff   : > { %v543_v20 = vor.u32 %v542_v12, %v541_v5  ;;  %v546_v21 = vor.u32 %v545_v14, %v544_v7  ;;  %v1364_v36 = vshll.u32 %v2839_v60, %v1361_v63  ;;  %v1365_v40 = vshrl.u32 %v2840_v0, %v1362_v18 }
 0x100   : > { %v551_v24 = vsel %vm547_vm3, %v531_v11, %v534_v15  ;;  %v552_v25 = vsel %vm550_vm6, %v540_v17, 2102212464  ;;  %v555_v28 = vsel %vm547_vm3, %v534_v15, %v537_v16  ;;  %v559_v30 = vsel %vm547_vm3, %v537_v16, %v540_v17 }
 0x101   : > { %v553_v33 = vsel %vm549_vm5, %v537_v16, %v552_v25  ;;  %v556_v34 = vsel %vm550_vm6, %v543_v20, 920167782  ;;  %v560_v35 = vsel %vm550_vm6, %v546_v21, 1326507024  ;;  %v1367_v41 = vshll.u32 %v2840_v0, %v1361_v63 }
 0x102   : > { %v557_v37 = vsel %vm549_vm5, %v540_v17, %v556_v34  ;;  %v561_v38 = vsel %vm549_vm5, %v543_v20, %v560_v35  ;;  %v554_v42 = vsel %vm548_vm4, %v551_v24, %v553_v33  ;;  %v1368_v46 = vshrl.u32 %v2841_v2, %v1362_v18 }
 0x103   : > { %v558_v43 = vsel %vm548_vm4, %v555_v28, %v557_v37  ;;  %v562_v45 = vsel %vm548_vm4, %v559_v30, %v561_v38  ;;  %v1366_v59 = vor.u32 %v1365_v40, %v1364_v36  ;;  %v1370_v1 = vshll.u32 %v2841_v2, %v1361_v63 }
 0x104   : > { %v2995_v48 = vmul.u32.u64.low %v2959_v53, %v562_v45  ;;  %v2996_v50 = vmul.u32.u64.high %v2959_v53, %v562_v45, %v2995_v48  ;;  %v2999_v52 = vmul.u32.u64.low %v2959_v53, %v558_v43  ;;  %v3000_v54 = vmul.u32.u64.high %v2959_v53, %v558_v43, %v2999_v52 }
 0x105   : > { %v1369_v61 = vor.u32 %v1368_v46, %v1367_v41  ;;  %v1371_v3 = vshrl.u32 %v2842_v4, %v1362_v18  ;;  %v1363_v5 = vshrl.u32 %v2839_v60, %v1362_v18  ;;  %v1373_v51 = vshll.u32 %v2842_v4, %v1361_v63 }
 0x106   : > { %v1374_v7 = vshrl.u32 %v2843_v6, %v1362_v18  ;;  %v1377_v8 = vshrl.u32 %v2844_v13, %v1362_v18  ;;  %v570_v9 = vmul.u32 %v2959_v53, %v554_v42  ;;  %v1376_v11 = vshll.u32 %v2843_v6, %v1361_v63 }
 0x107   : > { %v1372_v10 = vor.u32 %v1371_v3, %v1370_v1  ;;  %vm1379_vm8 = vcmp.lt.s32.totalorder %v2971_v62, 1  ;;  %vm572_vm9 = vc.u32 %v2996_v50, %v2999_v52  ;;  %v573_v12 = vadd.s32 1, %v3000_v54  ;;  %v3040_v1 = vpop.f32.mrb[4].mxu0 }
 0x108   : > { %v1375_v14 = vor.u32 %v1374_v7, %v1373_v51  ;;  %vm1380_vm10 = vcmp.lt.s32.totalorder %v2971_v62, 2  ;;  %v1378_v15 = vor.u32 %v1377_v8, %v1376_v11  ;;  %vm1381_vm11 = vcmp.lt.s32.totalorder %v2971_v62, 3 }
 0x109   : > { %vm1382_vm12 = vcmp.lt.s32.totalorder %v2971_v62, 4  ;;  %v1387_v16 = vsel %vm1379_vm8, %v1366_v59, %v1369_v61  ;;  %v574_v53 = vsel %vm572_vm9, %v573_v12, %v3000_v54  ;;  %v1391_v63 = vsel %vm1379_vm8, %v1369_v61, %v1372_v10 }
 0x10a   : > { %v1384_v17 = vsel %vm1382_vm12, %v1372_v10, 2102212464  ;;  %v1388_v18 = vsel %vm1382_vm12, %v1375_v14, 920167782  ;;  %v575_v20 = vadd.s32 %v574_v53, %v570_v9  ;;  %v1383_v21 = vsel %vm1379_vm8, %v1363_v5, %v1366_v59 }
 0x10b   : > { %v1389_v24 = vsel %vm1381_vm11, %v1372_v10, %v1388_v18  ;;  %v1392_v25 = vsel %vm1382_vm12, %v1378_v15, 1326507024  ;;  %v1385_v28 = vsel %vm1381_vm11, %v1369_v61, %v1384_v17  ;;  %v423_v34 = vsel %vm422_vm7, %v2967_v57, 0 }
 0x10c   : > { %v1390_v30 = vsel %vm1380_vm10, %v1387_v16, %v1389_v24  ;;  %v1393_v33 = vsel %vm1381_vm11, %v1375_v14, %v1392_v25  ;;  %v576_v35 = vadd.s32 536870912, %v575_v20  ;;  %v1243_v42 = vand.u32 2147483647, %v2954_v44 }
 0x10d   : > { %v1394_v36 = vsel %vm1380_vm10, %v1391_v63, %v1393_v33  ;;  %v3025_v37 = vmul.u32.u64.low %v2961_v55, %v1390_v30  ;;  %v3026_v38 = vmul.u32.u64.high %v2961_v55, %v1390_v30, %v3025_v37  ;;  %v1386_v45 = vsel %vm1380_vm10, %v1383_v21, %v1385_v28 }
 0x10e   : > { %v3030_v40 = vmul.u32.u64.low %v2961_v55, %v1394_v36  ;;  %v3031_v41 = vmul.u32.u64.high %v2961_v55, %v1394_v36, %v3030_v40  ;;  %v577_v43 = vshrl.u32 %v576_v35, 30  ;;  %v419_v57 = vor.u32 8388608, %v2965_v56 }
 0x10f   : > { %v425_v46 = vand.u32 31, %v423_v34  ;;  %v1405_v54 = vadd.s32 1, %v3026_v38  ;;  %v1247_v61 = vshrl.u32 %v1246_v58, 23  ;;  %v1402_v3 = vmul.u32 %v2961_v55, %v1386_v45 }
 0x110   : > { %v578_v48 = vshll.u32 %v577_v43, 30  ;;  %vm1404_vm13 = vc.u32 %v3031_v41, %v3025_v37  ;;  %v3047_v62 = vand.u32 8388607, %v1243_v42  ;;  %v3053_v51 = vshll.u32 %v419_v57, 8 }
 0x111   : > { %v426_v59 = vsub.s32 32, %v425_v46  ;;  %v1406_v5 = vsel %vm1404_vm13, %v1405_v54, %v3026_v38  ;;  %v571_v55 = vadd.s32 %v2999_v52, %v2996_v50  ;;  %v3062_v8 = vshrl.u32 %v423_v34, 5 }
 0x112   : > { %v3050_v56 = vsub.s32 %v575_v20, %v578_v48  ;;  %v1407_v7 = vadd.s32 %v1406_v5, %v1402_v3  ;;  %v2423_v14 = vadd.s32 4294967169, %v1247_v61  ;;  %v601_v15 = vsub.s32 4, %v577_v43 }
 0x113   : > { %v429_v9 = vshrl.u32 %v2840_v0, %v426_v59  ;;  %v432_v11 = vshrl.u32 %v2841_v2, %v426_v59  ;;  %v435_v12 = vshrl.u32 %v2842_v4, %v426_v59  ;;  %v428_v27 = vshll.u32 %v2839_v60, %v425_v46 }
 0x114   : > { %v581_v10 = vsub.s32 0, %v3050_v56  ;;  %v1408_v16 = vadd.s32 536870912, %v1407_v7  ;;  %v1251_v53 = vor.u32 8388608, %v3047_v62  ;;  %v431_v52 = vshll.u32 %v2840_v0, %v425_v46 }
 0x115   : > { %v434_v17 = vshll.u32 %v2841_v2, %v425_v46  ;;  %v438_v18 = vshrl.u32 %v2843_v6, %v426_v59  ;;  %v430_v20 = vor.u32 %v429_v9, %v428_v27  ;;  %v437_v21 = vshll.u32 %v2842_v4, %v425_v46 }
 0x116   : > { %v2396_v50 = vmin.u32 %v581_v10, %v3050_v56  ;;  %v1409_v63 = vshrl.u32 %v1408_v16, 30  ;;  %v441_v24 = vshrl.u32 %v2844_v13, %v426_v59  ;;  %v433_v28 = vor.u32 %v432_v11, %v431_v52 }
 0x117   : > { %v436_v30 = vor.u32 %v435_v12, %v434_v17  ;;  %v440_v33 = vshll.u32 %v2843_v6, %v425_v46  ;;  %v602_v34 = vsel %vm517_vm14, %v601_v15, %v577_v43  ;;  %v439_v36 = vor.u32 %v438_v18, %v437_v21 }
 0x118   : > { %v583_v25 = vclz %v2396_v50  ;;  %v1410_v35 = vshll.u32 %v1409_v63, 30  ;;  %vm443_vm0 = vcmp.lt.s32.totalorder %v3062_v8, 1  ;;  %vm444_vm1 = vcmp.lt.s32.totalorder %v3062_v8, 2 }
 0x119   : > { %v442_v40 = vor.u32 %v441_v24, %v440_v33  ;;  %vm446_vm2 = vcmp.lt.s32.totalorder %v3062_v8, 4  ;;  %vm1349_vm3 = vcmp.lt.s32.totalorder %v2933_v23, 0  ;;  %v427_v57 = vshrl.u32 %v2839_v60, %v426_v59 }
 0x11a   : > { %v2397_v38 = vadd.s32 4294967294, %v583_v25  ;;  %v3083_v45 = vsub.s32 %v1407_v7, %v1410_v35  ;;  %vm445_vm4 = vcmp.lt.s32.totalorder %v3062_v8, 3  ;;  %v452_v43 = vsel %vm446_vm2, %v439_v36, 920167782 }
 0x11b   : > { %v604_v46 = vsel %vm3057_vm15, 0, %v602_v34  ;;  %v451_v48 = vsel %vm443_vm0, %v430_v20, %v433_v28  ;;  %v453_v54 = vsel %vm445_vm4, %v436_v30, %v452_v43  ;;  %v1433_v5 = vsub.s32 4, %v1409_v63 }
 0x11c   : > { %vm2398_vm5 = vcmp.lt.s32.totalorder %v2397_v38, 0  ;;  %v1413_v3 = vsub.s32 0, %v3083_v45  ;;  %v455_v59 = vsel %vm443_vm0, %v433_v28, %v436_v30  ;;  %vm3100_vm6 = vcmp.le.f32.partialorder %v1347_v29, 0.7853982 }
 0x11d   : > { %v586_v61 = vsel %vm2398_vm5, 0, %v2397_v38  ;;  %v448_v11 = vsel %vm446_vm2, %v436_v30, 2102212464  ;;  %v456_v12 = vsel %vm446_vm2, %v442_v40, 1326507024  ;;  %v454_v27 = vsel %vm444_vm1, %v451_v48, %v453_v54  ;;  %v3120_v30 = vpop.f32.mrb[4].mxu1 }
 0x11e   : > { %v587_v7 = vsub.s32 32, %v586_v61  ;;  %v591_v9 = vsub.s32 4294967266, %v586_v61  ;;  %v588_v15 = vshll.u32 %v3050_v56, %v586_v61  ;;  %v2428_v16 = vmin.u32 %v1413_v3, %v3083_v45 }
 0x11f   : > { %v457_v50 = vsel %vm445_vm4, %v439_v36, %v456_v12  ;;  %v1253_v18 = vadd.s32 1, %v2423_v14  ;;  %v608_v21 = vadd.s32 3, %v604_v46  ;;  %v447_v25 = vsel %vm443_vm0, %v427_v57, %v430_v20 }
 0x120   : > { %v589_v29 = vshrl.u32 %v571_v55, %v587_v7  ;;  %v592_v52 = vadd.s32 127, %v591_v9  ;;  %v458_v17 = vsel %vm444_vm1, %v455_v59, %v457_v50  ;;  %v1415_v24 = vclz %v2428_v16 }
 0x121   : > { %v449_v56 = vsel %vm445_vm4, %v433_v28, %v448_v11  ;;  %v3123_v35 = vmul.u32.u64.low %v3053_v51, %v458_v17  ;;  %v3124_v55 = vmul.u32.u64.high %v3053_v51, %v458_v17, %v3123_v35  ;;  %vm1254_vm7 = vcmp.gt.s32.totalorder %v1253_v18, 0 }
 0x122   : > { %v590_v33 = vor.u32 %v589_v29, %v588_v15  ;;  %v593_v34 = vshll.u32 %v592_v52, 23  ;;  %v2429_v36 = vadd.s32 4294967294, %v1415_v24  ;;  %v1403_v20 = vadd.s32 %v3025_v37, %v3031_v41 }
 0x123   : > { %v3127_v38 = vmul.u32.u64.low %v3053_v51, %v454_v27  ;;  %v3128_v14 = vmul.u32.u64.high %v3053_v51, %v454_v27, %v3127_v38  ;;  %v1434_v28 = vsel %vm1349_vm3, %v1433_v5, %v1409_v63  ;;  %v1255_v57 = vsel %vm1254_vm7, %v1253_v18, 0 }
 0x124   : > { %v594_v40 = vor.u32 4788187, %v593_v34  ;;  %v3135_v43 = vand.u32 3, %v608_v21  ;;  %vm2430_vm8 = vcmp.lt.s32.totalorder %v2429_v36, 0  ;;  %v450_v46 = vsel %vm444_vm1, %v447_v25, %v449_v56 }
 0x125   : > { %v1257_v48 = vand.u32 31, %v1255_v57  ;;  %v597_v61 = vcvt.s32.f32 %v590_v33  ;;  %v1418_v3 = vsel %vm2430_vm8, 0, %v2429_v36  ;;  %vm468_vm9 = vc.u32 %v3124_v55, %v3127_v38 }
 0x126   : > { %v595_v54 = vand.u32 2147483647, %v594_v40  ;;  %v1419_v59 = vsub.s32 32, %v1418_v3  ;;  %v1423_v7 = vsub.s32 4294967266, %v1418_v3  ;;  %v1436_v37 = vsel %vm3100_vm6, 0, %v1434_v28 }
 0x127   : > { %v469_v41 = vadd.s32 1, %v3128_v14  ;;  %v466_v5 = vmul.u32 %v3053_v51, %v450_v46  ;;  %v3145_v9 = vshrl.u32 %v1255_v57, 5  ;;  %v1258_v8 = vsub.s32 32, %v1257_v48 }
 0x128   : > { %v598_v63 = vmul.f32 %v597_v61, %v595_v54  ;;  %v1420_v11 = vshll.u32 %v3083_v45, %v1418_v3  ;;  %v1421_v12 = vshrl.u32 %v1403_v20, %v1419_v59  ;;  %v1424_v15 = vadd.s32 127, %v1423_v7 }
 0x129   : > { %v470_v16 = vsel %vm468_vm9, %v469_v41, %v3128_v14  ;;  %v1260_v29 = vshll.u32 %v2839_v60, %v1257_v48  ;;  %v1261_v52 = vshrl.u32 %v2840_v0, %v1258_v8  ;;  %v1263_v21 = vshll.u32 %v2840_v0, %v1257_v48 }
 0x12a   : > { %v599_v27 = vxor.u32 2147483648, %v598_v63  ;;  %v471_v50 = vadd.s32 %v470_v16, %v466_v5  ;;  %v1422_v17 = vor.u32 %v1421_v12, %v1420_v11  ;;  %v1425_v18 = vshll.u32 %v1424_v15, 23 }
 0x12b   : > { %v1264_v51 = vshrl.u32 %v2841_v2, %v1258_v8  ;;  %v1266_v25 = vshll.u32 %v2841_v2, %v1257_v48  ;;  %v1267_v56 = vshrl.u32 %v2842_v4, %v1258_v8  ;;  %v1262_v35 = vor.u32 %v1261_v52, %v1260_v29 }
 0x12c   : > { %v600_v24 = vsel %vm517_vm14, %v599_v27, %v598_v63  ;;  %v472_v45 = vadd.s32 536870912, %v471_v50  ;;  %v1426_v34 = vor.u32 4788187, %v1425_v18  ;;  %v1269_v36 = vshll.u32 %v2842_v4, %v1257_v48 }
 0x12d   : > { %v603_v33 = vsel %vm3057_vm15, %v2930_v22, %v600_v24  ;;  %v1429_v14 = vcvt.s32.f32 %v1422_v17  ;;  %v1270_v20 = vshrl.u32 %v2843_v6, %v1258_v8  ;;  %v1265_v57 = vor.u32 %v1264_v51, %v1263_v21 }
 0x12e   : > { %2685 = vcosq.f32 %v603_v33  ;;  %v3161_v40 = vshrl.u32 %v472_v45, 30  ;;  %v1427_v28 = vand.u32 2147483647, %v1426_v34  ;;  %v1273_v46 = vshrl.u32 %v2844_v13, %v1258_v8 }
 0x12f   : > { %2687 = vsinq.f32 %v603_v33  ;;  %v1271_v61 = vor.u32 %v1270_v20, %v1269_v36  ;;  %v1268_v3 = vor.u32 %v1267_v56, %v1266_v25  ;;  %v1272_v59 = vshll.u32 %v2843_v6, %v1257_v48 }
 0x130   : > { %v474_v54 = vshll.u32 %v3161_v40, 30  ;;  %v1430_v58 = vmul.f32 %v1429_v14, %v1427_v28  ;;  %v1440_v7 = vadd.s32 3, %v1436_v37  ;;  %vm1275_vm10 = vcmp.lt.s32.totalorder %v3145_v9, 1 }
 0x131   : > { %v3172_v63 = vshll.u32 %v1251_v53, 8  ;;  %vm611_vm11 = vcmp.eq.s32.totalorder %v3135_v43, 0  ;;  %v1274_v11 = vor.u32 %v1273_v46, %v1272_v59  ;;  %vm1278_vm12 = vcmp.lt.s32.totalorder %v3145_v9, 4 }
 0x132   : > { %v3167_v41 = vsub.s32 %v471_v50, %v474_v54  ;;  %v1431_v5 = vxor.u32 2147483648, %v1430_v58  ;;  %v1283_v12 = vsel %vm1275_vm10, %v1262_v35, %v1265_v57  ;;  %vm610_vm13 = vcmp.lt.s32.totalorder %v3135_v43, 2 }
 0x133   : > { %vm2075_vm14 = vcmask 261120   ;;  %v1259_v37 = vshrl.u32 %v2839_v60, %v1258_v8  ;;  %vm1277_vm15 = vcmp.lt.s32.totalorder %v3145_v9, 3  ;;  %v1284_v62 = vsel %vm1278_vm12, %v1271_v61, 920167782 }
 0x134   : > { %v477_v48 = vsub.s32 0, %v3167_v41  ;;  %vm607_vm0 = vweird.f32 %v2930_v22  ;;  %v1432_v53 = vsel %vm1349_vm3, %v1431_v5, %v1430_v58  ;;  %vm413_vm1 = vcmp.lt.s32.totalorder %v2936_v26, 0 }
 0x135   : > { %vm1276_vm2 = vcmp.lt.s32.totalorder %v3145_v9, 2  ;;  %v1280_v15 = vsel %vm1278_vm12, %v1268_v3, 2102212464  ;;  %v1285_v8 = vsel %vm1277_vm15, %v1268_v3, %v1284_v62  ;;  %v1435_v16 = vsel %vm3100_vm6, %v2933_v23, %v1432_v53 }
 0x136   : > { %v2392_v27 = vmin.u32 %v477_v48, %v3167_v41  ;;  %v1286_v50 = vsel %vm1276_vm2, %v1283_v12, %v1285_v8  ;;  %v1287_v29 = vsel %vm1275_vm10, %v1265_v57, %v1268_v3  ;;  %2689 = vcosq.f32 %v1435_v16 }
 0x137   : > { %v1288_v52 = vsel %vm1278_vm12, %v1274_v11, 1326507024  ;;  %v3205_v17 = vmul.u32.u64.low %v3172_v63, %v1286_v50  ;;  %v3206_v18 = vmul.u32.u64.high %v3172_v63, %v1286_v50, %v3205_v17  ;;  %vm614_vm3 = vcmp.eq.s32.totalorder %v3135_v43, 2 }
 0x138   : > { %v2686_v21 = vpop.eup %2685  ;;  %2691 = vsinq.f32 %v1435_v16  ;;  %v479_v10 = vclz %v2392_v27  ;;  %v497_v51 = vsub.s32 4, %v3161_v40  ;;  %v1279_v25 = vsel %vm1275_vm10, %v1259_v37, %v1262_v35 }
 0x139   : > { %v2688_v24 = vpop.eup %2687  ;;  %v615_v45 = vxor.u32 2147483648, %v2686_v21  ;;  %v1281_v56 = vsel %vm1277_vm15, %v1265_v57, %v1280_v15  ;;  %v1289_v33 = vsel %vm1277_vm15, %v1271_v61, %v1288_v52  ;;  %v3221_v20 = vadd.f32 %v2942_v31, %v2927_v19 }
 0x13a   : > { %v612_v34 = vxor.u32 2147483648, %v2688_v24  ;;  %v2393_v36 = vadd.s32 4294967294, %v479_v10  ;;  %v1290_v14 = vsel %vm1276_vm2, %v1287_v29, %v1289_v33  ;;  %v1441_v46 = vand.u32 3, %v1440_v7 }
 0x13b   : > { %v616_v28 = vsel %vm614_vm3, %v615_v45, %v2688_v24  ;;  %v3224_v54 = vmul.u32.u64.low %v3172_v63, %v1290_v14  ;;  %v3225_v35 = vmul.u32.u64.high %v3172_v63, %v1290_v14, %v3224_v54  ;;  %v1282_v61 = vsel %vm1276_vm2, %v1279_v25, %v1281_v56 }
 0x13c   : > { %v613_v57 = vsel %vm611_vm11, %v2686_v21, %v612_v34  ;;  %vm2394_vm4 = vcmp.lt.s32.totalorder %v2393_v36, 0  ;;  %v1301_v58 = vadd.s32 1, %v3206_v18  ;;  %v467_v31 = vadd.s32 %v3127_v38, %v3124_v55 }
 0x13d   : > { %v617_v3 = vsel %vm610_vm13, %v613_v57, %v616_v28  ;;  %v482_v59 = vsel %vm2394_vm4, 0, %v2393_v36  ;;  %v726_v7 = vand.u32 2139095040, %v3221_v20  ;;  %vm1439_vm5 = vweird.f32 %v2933_v23 }
 0x13e   : > { %v618_v5 = vsel %vm607_vm0, nan, %v617_v3  ;;  %v483_v11 = vsub.s32 32, %v482_v59  ;;  %v487_v12 = vsub.s32 4294967266, %v482_v59  ;;  %v498_v9 = vsel %vm413_vm1, %v497_v51, %v3161_v40  ;;  %v3253_v40 = vpop.f32.mrb[5].mxu0 }
 0x13f   : > { %2077 = vst.msk [vmem:[%s3243_s8 + $0x8] sm:$0xff] %vm2075_vm14, %v618_v5  ;;  %v1298_v55 = vmul.u32 %v3172_v63, %v1282_v61  ;;  %vm1300_vm6 = vc.u32 %v3225_v35, %v3205_v17  ;;  %v723_v22 = vand.u32 2147483647, %v3221_v20  ;;  %v727_v38 = vshrl.u32 %v726_v7, 23 }
 0x140   : > { %v484_v43 = vshll.u32 %v3167_v41, %v482_v59  ;;  %v485_v48 = vshrl.u32 %v467_v31, %v483_v11  ;;  %v488_v37 = vadd.s32 127, %v487_v12  ;;  %v1302_v62 = vsel %vm1300_vm6, %v1301_v58, %v3206_v18  ;;  %v2690_v53 = vpop.eup %2689 }
 0x141   : > { %vm1446_vm7 = vcmp.eq.s32.totalorder %v1441_v46, 2  ;;  %vm3257_vm8 = vcmp.le.f32.partialorder %v411_v47, 0.7853982  ;;  %v1303_v15 = vadd.s32 %v1302_v62, %v1298_v55  ;;  %v2403_v8 = vadd.s32 4294967169, %v727_v38 }
 0x142   : > { %v2692_v16 = vpop.eup %2691  ;;  %v1447_v27 = vxor.u32 2147483648, %v2690_v53  ;;  %v486_v50 = vor.u32 %v485_v48, %v484_v43  ;;  %v489_v41 = vshll.u32 %v488_v37, 23  ;;  %v500_v29 = vsel %vm3257_vm8, 0, %v498_v9 }
 0x143   : > { %v1444_v52 = vxor.u32 2147483648, %v2692_v16  ;;  %v1304_v18 = vadd.s32 536870912, %v1303_v15  ;;  %v730_v21 = vand.u32 8388607, %v723_v22  ;;  %v733_v10 = vadd.s32 1, %v2403_v8 }
 0x144   : > { %vm1442_vm9 = vcmp.lt.s32.totalorder %v1441_v46, 2  ;;  %vm1443_vm10 = vcmp.eq.s32.totalorder %v1441_v46, 0  ;;  %v1448_v47 = vsel %vm1446_vm7, %v1447_v27, %v2692_v16  ;;  %v490_v51 = vor.u32 4788187, %v489_v41 }
 0x145   : > { %v1445_v24 = vsel %vm1443_vm10, %v2690_v53, %v1444_v52  ;;  %v504_v45 = vadd.s32 3, %v500_v29  ;;  %v3265_v25 = vshrl.u32 %v1304_v18, 30  ;;  %vm734_vm11 = vcmp.gt.s32.totalorder %v733_v10, 0 }
 0x146   : > { %v1449_v56 = vsel %vm1442_vm9, %v1445_v24, %v1448_v47  ;;  %v491_v33 = vand.u32 2147483647, %v490_v51  ;;  %v493_v34 = vcvt.s32.f32 %v486_v50  ;;  %v735_v36 = vsel %vm734_vm11, %v733_v10, 0  ;;  %v3321_v47 = vpop.f32.mrb[5].mxu1 }
 0x147   : > { %v1450_v14 = vsel %vm1439_vm5, nan, %v1449_v56  ;;  %v1306_v28 = vshll.u32 %v3265_v25, 30  ;;  %v731_v54 = vor.u32 8388608, %v730_v21  ;;  %v737_v57 = vand.u32 31, %v735_v36 }
 0x148   : > { %2085 = vst.msk [vmem:[%s3243_s8 + $0x48] sm:$0xff] %vm2075_vm14, %v1450_v14  ;;  %v494_v46 = vmul.f32 %v493_v34, %v491_v33  ;;  %v3272_v61 = vand.u32 3, %v504_v45  ;;  %v1299_v31 = vadd.s32 %v3205_v17, %v3225_v35  ;;  %v3280_v23 = vadd.f32 %v2944_v32, %v2927_v19 }
 0x149   : > { %v3274_v58 = vsub.s32 %v1303_v15, %v1306_v28  ;;  %v738_v59 = vsub.s32 32, %v737_v57  ;;  %v3283_v5 = vshrl.u32 %v735_v36, 5  ;;  %v3285_v11 = vshll.u32 %v731_v54, 8 }
 0x14a   : > { %v495_v3 = vxor.u32 2147483648, %v494_v46  ;;  %v3289_v12 = vadd.f32 %v2927_v19, %v2951_v39  ;;  %v740_v17 = vshll.u32 %v2839_v60, %v737_v57  ;;  %v743_v43 = vshll.u32 %v2840_v0, %v737_v57 }
 0x14b   : > { %v1309_v7 = vsub.s32 0, %v3274_v58  ;;  %v741_v35 = vshrl.u32 %v2840_v0, %v738_v59  ;;  %v744_v32 = vshrl.u32 %v2841_v2, %v738_v59  ;;  %v747_v19 = vshrl.u32 %v2842_v4, %v738_v59 }
 0x14c   : > { %v496_v9 = vsel %vm413_vm1, %v495_v3, %v494_v46  ;;  %v1329_v39 = vsub.s32 4, %v3265_v25  ;;  %v746_v48 = vshll.u32 %v2841_v2, %v737_v57  ;;  %v1558_v37 = vand.u32 2139095040, %v3280_v23 }
 0x14d   : > { %v499_v55 = vsel %vm3257_vm8, %v2936_v26, %v496_v9  ;;  %v2424_v38 = vmin.u32 %v1309_v7, %v3274_v58  ;;  %v742_v53 = vor.u32 %v741_v35, %v740_v17  ;;  %v745_v15 = vor.u32 %v744_v32, %v743_v43 }
 0x14e   : > { %2693 = vcosq.f32 %v499_v55  ;;  %v748_v8 = vor.u32 %v747_v19, %v746_v48  ;;  %v749_v63 = vshll.u32 %v2842_v4, %v737_v57  ;;  %v750_v16 = vshrl.u32 %v2843_v6, %v738_v59 }
 0x14f   : > { %2695 = vsinq.f32 %v499_v55  ;;  %v1311_v62 = vclz %v2424_v38  ;;  %vm755_vm12 = vcmp.lt.s32.totalorder %v3283_v5, 1  ;;  %v752_v50 = vshll.u32 %v2843_v6, %v737_v57 }
 0x150   : > { %v753_v41 = vshrl.u32 %v2844_v13, %v738_v59  ;;  %vm756_vm13 = vcmp.lt.s32.totalorder %v3283_v5, 2  ;;  %vm510_vm15 = vcmp.eq.s32.totalorder %v3272_v61, 2  ;;  %v739_v29 = vshrl.u32 %v2839_v60, %v738_v59 }
 0x151   : > { %v2425_v27 = vadd.s32 4294967294, %v1311_v62  ;;  %v751_v52 = vor.u32 %v750_v16, %v749_v63  ;;  %vm757_vm0 = vcmp.lt.s32.totalorder %v3283_v5, 3  ;;  %vm758_vm1 = vcmp.lt.s32.totalorder %v3283_v5, 4 }
 0x152   : > { %vm507_vm2 = vcmp.eq.s32.totalorder %v3272_v61, 0  ;;  %vm1245_vm3 = vcmp.lt.s32.totalorder %v2954_v44, 0  ;;  %v754_v18 = vor.u32 %v753_v41, %v752_v50  ;;  %v760_v21 = vsel %vm758_vm1, %v748_v8, 2102212464 }
 0x153   : > { %vm2426_vm4 = vcmp.lt.s32.totalorder %v2425_v27, 0  ;;  %v763_v10 = vsel %vm755_vm12, %v742_v53, %v745_v15  ;;  %vm506_vm5 = vcmp.lt.s32.totalorder %v3272_v61, 2  ;;  %v759_v24 = vsel %vm755_vm12, %v739_v29, %v742_v53 }
 0x154   : > { %v1314_v51 = vsel %vm2426_vm4, 0, %v2425_v27  ;;  %v764_v45 = vsel %vm758_vm1, %v751_v52, 920167782  ;;  %v1559_v56 = vshrl.u32 %v1558_v37, 23  ;;  %vm503_vm6 = vweird.f32 %v2936_v26 }
 0x155   : > { %v1315_v33 = vsub.s32 32, %v1314_v51  ;;  %v1319_v34 = vsub.s32 4294967266, %v1314_v51  ;;  %v765_v36 = vsel %vm757_vm0, %v748_v8, %v764_v45  ;;  %v767_v14 = vsel %vm755_vm12, %v745_v15, %v748_v8 }
 0x156   : > { %vm3335_vm7 = vcmp.le.f32.partialorder %v1243_v42, 0.7853982  ;;  %v761_v54 = vsel %vm757_vm0, %v745_v15, %v760_v21  ;;  %v766_v46 = vsel %vm756_vm13, %v763_v10, %v765_v36  ;;  %v768_v57 = vsel %vm758_vm1, %v754_v18, 1326507024 }
 0x157   : > { %v2435_v3 = vadd.s32 4294967169, %v1559_v56  ;;  %v1316_v59 = vshll.u32 %v3274_v58, %v1314_v51  ;;  %v1317_v7 = vshrl.u32 %v1299_v31, %v1315_v33  ;;  %v1320_v9 = vadd.s32 127, %v1319_v34 }
 0x158   : > { %v769_v42 = vsel %vm757_vm0, %v751_v52, %v768_v57  ;;  %v2694_v17 = vpop.eup %2693  ;;  %v3351_v32 = vmul.u32.u64.low %v3285_v11, %v766_v46  ;;  %v3352_v55 = vmul.u32.u64.high %v3285_v11, %v766_v46, %v3351_v32  ;;  %v1555_v58 = vand.u32 2147483647, %v3280_v23 }
 0x159   : > { %v770_v35 = vsel %vm756_vm13, %v767_v14, %v769_v42  ;;  %v1565_v38 = vadd.s32 1, %v2435_v3  ;;  %v2696_v43 = vpop.eup %2695  ;;  %v511_v19 = vxor.u32 2147483648, %v2694_v17  ;;  %v1318_v48 = vor.u32 %v1317_v7, %v1316_v59 }
 0x15a   : > { %v1321_v37 = vshll.u32 %v1320_v9, 23  ;;  %v508_v31 = vxor.u32 2147483648, %v2696_v43  ;;  %v3357_v62 = vmul.u32.u64.low %v3285_v11, %v770_v35  ;;  %v3358_v53 = vmul.u32.u64.high %v3285_v11, %v770_v35, %v3357_v62 }
 0x15b   : > { %vm1566_vm8 = vcmp.gt.s32.totalorder %v1565_v38, 0  ;;  %v512_v15 = vsel %vm510_vm15, %v511_v19, %v2696_v43  ;;  %v762_v63 = vsel %vm756_vm13, %v759_v24, %v761_v54  ;;  %v1330_v50 = vsel %vm1245_vm3, %v1329_v39, %v3265_v25 }
 0x15c   : > { %v1322_v8 = vor.u32 4788187, %v1321_v37  ;;  %v1567_v16 = vsel %vm1566_vm8, %v1565_v38, 0  ;;  %v509_v27 = vsel %vm507_vm2, %v2694_v17, %v508_v31  ;;  %v781_v41 = vadd.s32 1, %v3352_v55 }
 0x15d   : > { %v1569_v29 = vand.u32 31, %v1567_v16  ;;  %v513_v52 = vsel %vm506_vm5, %v509_v27, %v512_v15  ;;  %v1325_v21 = vcvt.s32.f32 %v1318_v48  ;;  %v1562_v5 = vand.u32 8388607, %v1555_v58 }
 0x15e   : > { %v1323_v18 = vand.u32 2147483647, %v1322_v8  ;;  %v514_v10 = vsel %vm503_vm6, nan, %v513_v52  ;;  %v778_v51 = vmul.u32 %v3285_v11, %v762_v63  ;;  %vm780_vm9 = vc.u32 %v3358_v53, %v3351_v32 }
 0x15f   : > { %v1570_v25 = vsub.s32 32, %v1569_v29  ;;  %2076 = vst.msk [vmem:[%s3243_s8] sm:$0xff] %vm2075_vm14, %v514_v10  ;;  %v1332_v61 = vsel %vm3335_vm7, 0, %v1330_v50  ;;  %v782_v24 = vsel %vm780_vm9, %v781_v41, %v3352_v55  ;;  %v1568_v45 = vshrl.u32 %v1567_v16, 5 }
 0x160   : > { %v1326_v39 = vmul.f32 %v1325_v21, %v1323_v18  ;;  %v783_v56 = vadd.s32 %v782_v24, %v778_v51  ;;  %v1572_v33 = vshll.u32 %v2839_v60, %v1569_v29  ;;  %v1575_v36 = vshll.u32 %v2840_v0, %v1569_v29 }
 0x161   : > { %v1573_v26 = vshrl.u32 %v2840_v0, %v1570_v25  ;;  %v1576_v11 = vshrl.u32 %v2841_v2, %v1570_v25  ;;  %v1578_v14 = vshll.u32 %v2841_v2, %v1569_v29  ;;  %v1579_v54 = vshrl.u32 %v2842_v4, %v1570_v25 }
 0x162   : > { %v1327_v34 = vxor.u32 2147483648, %v1326_v39  ;;  %v784_v46 = vadd.s32 536870912, %v783_v56  ;;  %v1581_v3 = vshll.u32 %v2842_v4, %v1569_v29  ;;  %v1582_v59 = vshrl.u32 %v2843_v6, %v1570_v25 }
 0x163   : > { %v1574_v57 = vor.u32 %v1573_v26, %v1572_v33  ;;  %v1577_v9 = vor.u32 %v1576_v11, %v1575_v36  ;;  %v1580_v42 = vor.u32 %v1579_v54, %v1578_v14  ;;  %v1585_v17 = vshrl.u32 %v2844_v13, %v1570_v25 }
 0x164   : > { %v1328_v7 = vsel %vm1245_vm3, %v1327_v34, %v1326_v39  ;;  %v785_v55 = vshrl.u32 %v784_v46, 30  ;;  %v1583_v38 = vor.u32 %v1582_v59, %v1581_v3  ;;  %v1584_v43 = vshll.u32 %v2843_v6, %v1569_v29 }
 0x165   : > { %v1331_v35 = vsel %vm3335_vm7, %v2954_v44, %v1328_v7  ;;  %v1336_v19 = vadd.s32 3, %v1332_v61  ;;  %v1563_v48 = vor.u32 8388608, %v1562_v5  ;;  %vm1587_vm10 = vcmp.lt.s32.totalorder %v1568_v45, 1 }
 0x166   : > { %2697 = vcosq.f32 %v1331_v35  ;;  %v786_v37 = vshll.u32 %v785_v55, 30  ;;  %v1586_v31 = vor.u32 %v1585_v17, %v1584_v43  ;;  %vm1590_vm11 = vcmp.lt.s32.totalorder %v1568_v45, 4 }
 0x167   : > { %2699 = vsinq.f32 %v1331_v35  ;;  %v1571_v62 = vshrl.u32 %v2839_v60, %v1570_v25  ;;  %vm1589_vm12 = vcmp.lt.s32.totalorder %v1568_v45, 3  ;;  %v1595_v15 = vsel %vm1587_vm10, %v1574_v57, %v1577_v9 }
 0x168   : > { %v1596_v28 = vsel %vm1590_vm11, %v1583_v38, 920167782  ;;  %v3404_v8 = vsub.s32 %v783_v56, %v786_v37  ;;  %vm1588_vm13 = vcmp.lt.s32.totalorder %v1568_v45, 2  ;;  %v1592_v63 = vsel %vm1590_vm11, %v1580_v42, 2102212464 }
 0x169   : > { %v1597_v16 = vsel %vm1589_vm12, %v1580_v42, %v1596_v28  ;;  %v809_v27 = vsub.s32 4, %v785_v55  ;;  %v1599_v41 = vsel %vm1587_vm10, %v1577_v9, %v1580_v42  ;;  %v1603_v29 = vshll.u32 %v1563_v48, 8 }
 0x16a   : > { %v1598_v50 = vsel %vm1588_vm13, %v1595_v15, %v1597_v16  ;;  %v1337_v52 = vand.u32 3, %v1336_v19  ;;  %v789_v18 = vsub.s32 0, %v3404_v8  ;;  %v1591_v21 = vsel %vm1587_vm10, %v1571_v62, %v1574_v57 }
 0x16b   : > { %v1600_v5 = vsel %vm1590_vm11, %v1586_v31, 1326507024  ;;  %v1593_v10 = vsel %vm1589_vm12, %v1577_v9, %v1592_v63  ;;  %v3415_v25 = vmul.u32.u64.low %v1603_v29, %v1598_v50  ;;  %v3416_v39 = vmul.u32.u64.high %v1603_v29, %v1598_v50, %v3415_v25  ;;  %v3449_v50 = vpop.f32.mrb[6].mxu0 }
 0x16c   : > { %v1601_v51 = vsel %vm1589_vm12, %v1583_v38, %v1600_v5  ;;  %vm1335_vm15 = vweird.f32 %v2954_v44  ;;  %vm725_vm0 = vcmp.lt.s32.totalorder %v3221_v20, 0  ;;  %v2404_v61 = vmin.u32 %v789_v18, %v3404_v8 }
 0x16d   : > { %v1602_v24 = vsel %vm1588_vm13, %v1599_v41, %v1601_v51  ;;  %v810_v56 = vsel %vm725_vm0, %v809_v27, %v785_v55  ;;  %v622_v11 = vand.u32 2139095040, %v3289_v12  ;;  %vm3430_vm1 = vcmp.le.f32.partialorder %v723_v22, 0.7853982 }
 0x16e   : > { %v3424_v33 = vmul.u32.u64.low %v1603_v29, %v1602_v24  ;;  %v3425_v26 = vmul.u32.u64.high %v1603_v29, %v1602_v24, %v3424_v33  ;;  %v791_v36 = vclz %v2404_v61  ;;  %v1594_v14 = vsel %vm1588_vm13, %v1591_v21, %v1593_v10 }
 0x16f   : > { %v619_v54 = vand.u32 2147483647, %v3289_v12  ;;  %vm1338_vm2 = vcmp.lt.s32.totalorder %v1337_v52, 2  ;;  %vm1339_vm3 = vcmp.eq.s32.totalorder %v1337_v52, 0  ;;  %v1613_v57 = vadd.s32 1, %v3416_v39 }
 0x170   : > { %v2698_v46 = vpop.eup %2697  ;;  %v623_v3 = vshrl.u32 %v622_v11, 23  ;;  %vm1342_vm4 = vcmp.eq.s32.totalorder %v1337_v52, 2  ;;  %v2405_v9 = vadd.s32 4294967294, %v791_v36  ;;  %v812_v22 = vsel %vm3430_vm1, 0, %v810_v56 }
 0x171   : > { %v2700_v59 = vpop.eup %2699  ;;  %v1343_v7 = vxor.u32 2147483648, %v2698_v46  ;;  %v1610_v17 = vmul.u32 %v1603_v29, %v1594_v14  ;;  %vm1612_vm5 = vc.u32 %v3425_v26, %v3415_v25  ;;  %v626_v38 = vand.u32 8388607, %v619_v54 }
 0x172   : > { %v1340_v42 = vxor.u32 2147483648, %v2700_v59  ;;  %v2399_v45 = vadd.s32 4294967169, %v623_v3  ;;  %vm2406_vm6 = vcmp.lt.s32.totalorder %v2405_v9, 0  ;;  %v1614_v55 = vsel %vm1612_vm5, %v1613_v57, %v3416_v39 }
 0x173   : > { %v1344_v35 = vsel %vm1342_vm4, %v1343_v7, %v2700_v59  ;;  %v794_v19 = vsel %vm2406_vm6, 0, %v2405_v9  ;;  %v1615_v48 = vadd.s32 %v1614_v55, %v1610_v17  ;;  %v779_v62 = vadd.s32 %v3351_v32, %v3358_v53 }
 0x174   : > { %v1341_v43 = vsel %vm1339_vm3, %v2698_v46, %v1340_v42  ;;  %v629_v37 = vadd.s32 1, %v2399_v45  ;;  %v795_v15 = vsub.s32 32, %v794_v19  ;;  %v799_v28 = vsub.s32 4294967266, %v794_v19 }
 0x175   : > { %v1345_v31 = vsel %vm1338_vm2, %v1341_v43, %v1344_v35  ;;  %v816_v16 = vadd.s32 3, %v812_v22  ;;  %v1616_v27 = vadd.s32 536870912, %v1615_v48  ;;  %v796_v41 = vshll.u32 %v3404_v8, %v794_v19  ;;  %v3461_v8 = vld [vmem:[%s4363_s2] ss:$0 sm:$0xff] }
 0x176   : > { %v1346_v63 = vsel %vm1335_vm15, nan, %v1345_v31  ;;  %vm630_vm7 = vcmp.gt.s32.totalorder %v629_v37, 0  ;;  %v797_v29 = vshrl.u32 %v779_v62, %v795_v15  ;;  %v800_v52 = vadd.s32 127, %v799_v28 }
 0x177   : > { %2084 = vst.msk [vmem:[%s3243_s8 + $0x40] sm:$0xff] %vm2075_vm14, %v1346_v63  ;;  %v631_v18 = vsel %vm630_vm7, %v629_v37, 0  ;;  %v1617_v21 = vshrl.u32 %v1616_v27, 30  ;;  %v627_v5 = vor.u32 8388608, %v626_v38  ;;  %v3454_v51 = vand.u32 3, %v816_v16 }
 0x178   : > { %v633_v32 = vand.u32 31, %v631_v18  ;;  %v798_v53 = vor.u32 %v797_v29, %v796_v41  ;;  %v801_v10 = vshll.u32 %v800_v52, 23  ;;  %vm1557_vm8 = vcmp.lt.s32.totalorder %v3280_v23, 0 }
 0x179   : > { %v1618_v44 = vshll.u32 %v1617_v21, 30  ;;  %v1611_v24 = vadd.s32 %v3415_v25, %v3425_v26  ;;  %v3465_v56 = vadd.f32 %v3461_v8, %v2957_v49  ;;  %v3469_v33 = vadd.f32 %v3461_v8, %v3040_v1 }
 0x17a   : > { %v634_v39 = vsub.s32 32, %v633_v32  ;;  %v802_v61 = vor.u32 4788187, %v801_v10  ;;  %v632_v36 = vshrl.u32 %v631_v18, 5  ;;  %v3474_v46 = vshll.u32 %v627_v5, 8 }
 0x17b   : > { %v3471_v11 = vsub.s32 %v1615_v48, %v1618_v44  ;;  %v805_v26 = vcvt.s32.f32 %v798_v53  ;;  %v1641_v59 = vsub.s32 4, %v1617_v21  ;;  %v636_v7 = vshll.u32 %v2839_v60, %v633_v32 }
 0x17c   : > { %v637_v14 = vshrl.u32 %v2840_v0, %v634_v39  ;;  %v803_v25 = vand.u32 2147483647, %v802_v61  ;;  %v640_v57 = vshrl.u32 %v2841_v2, %v634_v39  ;;  %v643_v3 = vshrl.u32 %v2842_v4, %v634_v39 }
 0x17d   : > { %v1621_v49 = vsub.s32 0, %v3471_v11  ;;  %v639_v1 = vshll.u32 %v2840_v0, %v633_v32  ;;  %v642_v22 = vshll.u32 %v2841_v2, %v633_v32  ;;  %v645_v42 = vshll.u32 %v2842_v4, %v633_v32 }
 0x17e   : > { %v806_v9 = vmul.f32 %v805_v26, %v803_v25  ;;  %v646_v17 = vshrl.u32 %v2843_v6, %v634_v39  ;;  %v638_v35 = vor.u32 %v637_v14, %v636_v7  ;;  %v649_v38 = vshrl.u32 %v2844_v13, %v634_v39 }
 0x17f   : > { %v2436_v45 = vmin.u32 %v1621_v49, %v3471_v11  ;;  %v641_v55 = vor.u32 %v640_v57, %v639_v1  ;;  %v644_v19 = vor.u32 %v643_v3, %v642_v22  ;;  %v648_v37 = vshll.u32 %v2843_v6, %v633_v32  ;;  %v3499_v32 = vpop.f32.mrb[6].mxu1 }
 0x180   : > { %v807_v43 = vxor.u32 2147483648, %v806_v9  ;;  %v647_v48 = vor.u32 %v646_v17, %v645_v42  ;;  %v1642_v62 = vsel %vm1557_vm8, %v1641_v59, %v1617_v21  ;;  %v635_v15 = vshrl.u32 %v2839_v60, %v634_v39 }
 0x181   : > { %v1623_v31 = vclz %v2436_v45  ;;  %v1454_v28 = vand.u32 2139095040, %v3465_v56  ;;  %v650_v16 = vor.u32 %v649_v38, %v648_v37  ;;  %vm651_vm9 = vcmp.lt.s32.totalorder %v632_v36, 1 }
 0x182   : > { %v808_v63 = vsel %vm725_vm0, %v807_v43, %v806_v9  ;;  %vm652_vm10 = vcmp.lt.s32.totalorder %v632_v36, 2  ;;  %vm653_vm11 = vcmp.lt.s32.totalorder %v632_v36, 3  ;;  %vm654_vm12 = vcmp.lt.s32.totalorder %v632_v36, 4 }
 0x183   : > { %v811_v27 = vsel %vm3430_vm1, %v3221_v20, %v808_v63  ;;  %v2437_v41 = vadd.s32 4294967294, %v1623_v31  ;;  %v656_v29 = vsel %vm654_vm12, %v644_v19, 2102212464  ;;  %v659_v52 = vsel %vm651_vm9, %v638_v35, %v641_v55 }
 0x184   : > { %2701 = vcosq.f32 %v811_v27  ;;  %v660_v18 = vsel %vm654_vm12, %v647_v48, 920167782  ;;  %v655_v21 = vsel %vm651_vm9, %v635_v15, %v638_v35  ;;  %v663_v10 = vsel %vm651_vm9, %v641_v55, %v644_v19 }
 0x185   : > { %2703 = vsinq.f32 %v811_v27  ;;  %vm2438_vm13 = vcmp.lt.s32.totalorder %v2437_v41, 0  ;;  %v661_v5 = vsel %vm653_vm11, %v644_v19, %v660_v18  ;;  %v664_v44 = vsel %vm654_vm12, %v650_v16, 1326507024 }
 0x186   : > { %v1626_v53 = vsel %vm2438_vm13, 0, %v2437_v41  ;;  %v662_v34 = vsel %vm652_vm10, %v659_v52, %v661_v5  ;;  %v657_v14 = vsel %vm653_vm11, %v641_v55, %v656_v29  ;;  %v665_v25 = vsel %vm653_vm11, %v647_v48, %v664_v44 }
 0x187   : > { %v1627_v39 = vsub.s32 32, %v1626_v53  ;;  %v1631_v61 = vsub.s32 4294967266, %v1626_v53  ;;  %v1628_v26 = vshll.u32 %v3471_v11, %v1626_v53  ;;  %v666_v57 = vsel %vm652_vm10, %v663_v10, %v665_v25 }
 0x188   : > { %v3508_v3 = vmul.u32.u64.low %v3474_v46, %v662_v34  ;;  %v3509_v49 = vmul.u32.u64.high %v3474_v46, %v662_v34, %v3508_v3  ;;  %v3513_v1 = vmul.u32.u64.low %v3474_v46, %v666_v57  ;;  %v3514_v9 = vmul.u32.u64.high %v3474_v46, %v666_v57, %v3513_v1 }
 0x189   : > { %v1629_v59 = vshrl.u32 %v1611_v24, %v1627_v39  ;;  %v1632_v7 = vadd.s32 127, %v1631_v61  ;;  %vm3518_vm15 = vcmp.le.f32.partialorder %v1555_v58, 0.7853982  ;;  %v658_v11 = vsel %vm652_vm10, %v655_v21, %v657_v14 }
 0x18a   : > { %v1455_v42 = vshrl.u32 %v1454_v28, 23  ;;  %v1644_v35 = vsel %vm3518_vm15, 0, %v1642_v62  ;;  %v677_v24 = vadd.s32 1, %v3509_v49  ;;  %v1451_v55 = vand.u32 2147483647, %v3465_v56 }
 0x18b   : > { %v1630_v17 = vor.u32 %v1629_v59, %v1628_v26  ;;  %v1633_v45 = vshll.u32 %v1632_v7, 23  ;;  %v934_v43 = vand.u32 2139095040, %v3469_v33  ;;  %vm819_vm0 = vcmp.eq.s32.totalorder %v3454_v51, 0 }
 0x18c   : > { %v2431_v38 = vadd.s32 4294967169, %v1455_v42  ;;  %v674_v19 = vmul.u32 %v3474_v46, %v658_v11  ;;  %vm676_vm1 = vc.u32 %v3514_v9, %v3508_v3  ;;  %vm822_vm2 = vcmp.eq.s32.totalorder %v3454_v51, 2 }
 0x18d   : > { %v1634_v58 = vor.u32 4788187, %v1633_v45  ;;  %v1648_v48 = vadd.s32 3, %v1644_v35  ;;  %v678_v37 = vsel %vm676_vm1, %v677_v24, %v3509_v49  ;;  %v1637_v63 = vcvt.s32.f32 %v1630_v17 }
 0x18e   : > { %v2702_v36 = vpop.eup %2701  ;;  %v1461_v31 = vadd.s32 1, %v2431_v38  ;;  %v679_v16 = vadd.s32 %v678_v37, %v674_v19  ;;  %v1458_v41 = vand.u32 8388607, %v1451_v55  ;;  %v935_v46 = vshrl.u32 %v934_v43, 23 }
 0x18f   : > { %v2704_v62 = vpop.eup %2703  ;;  %v823_v15 = vxor.u32 2147483648, %v2702_v36  ;;  %v1635_v28 = vand.u32 2147483647, %v1634_v58  ;;  %vm815_vm4 = vweird.f32 %v3221_v20  ;;  %vm818_vm5 = vcmp.lt.s32.totalorder %v3454_v51, 2 }
 0x190   : > { %v820_v27 = vxor.u32 2147483648, %v2704_v62  ;;  %vm1462_vm3 = vcmp.gt.s32.totalorder %v1461_v31, 0  ;;  %v680_v18 = vadd.s32 536870912, %v679_v16  ;;  %v3540_v44 = vand.u32 3, %v1648_v48 }
 0x191   : > { %v824_v29 = vsel %vm822_vm2, %v823_v15, %v2704_v62  ;;  %v1638_v52 = vmul.f32 %v1637_v63, %v1635_v28  ;;  %v1463_v21 = vsel %vm1462_vm3, %v1461_v31, 0  ;;  %v1459_v14 = vor.u32 8388608, %v1458_v41 }
 0x192   : > { %v821_v5 = vsel %vm819_vm0, %v2702_v36, %v820_v27  ;;  %v1465_v53 = vand.u32 31, %v1463_v21  ;;  %v3542_v39 = vshrl.u32 %v680_v18, 30  ;;  %v931_v26 = vand.u32 2147483647, %v3469_v33 }
 0x193   : > { %v825_v34 = vsel %vm818_vm5, %v821_v5, %v824_v29  ;;  %v1639_v10 = vxor.u32 2147483648, %v1638_v52  ;;  %v2411_v49 = vadd.s32 4294967169, %v935_v46  ;;  %v675_v35 = vadd.s32 %v3508_v3, %v3514_v9 }
 0x194   : > { %v826_v61 = vsel %vm815_vm4, nan, %v825_v34  ;;  %v1466_v25 = vsub.s32 32, %v1465_v53  ;;  %v682_v51 = vshll.u32 %v3542_v39, 30  ;;  %v1468_v57 = vshll.u32 %v2839_v60, %v1465_v53 }
 0x195   : > { %2079 = vst.msk [vmem:[%s3243_s8 + $0x18] sm:$0xff] %vm2075_vm14, %v826_v61  ;;  %v1640_v20 = vsel %vm1557_vm8, %v1639_v10, %v1638_v52  ;;  %v1471_v1 = vshll.u32 %v2840_v0, %v1465_v53  ;;  %v1474_v17 = vshll.u32 %v2841_v2, %v1465_v53  ;;  %v1464_v24 = vshrl.u32 %v1463_v21, 5 }
 0x196   : > { %v1643_v59 = vsel %vm3518_vm15, %v3280_v23, %v1640_v20  ;;  %v1469_v7 = vshrl.u32 %v2840_v0, %v1466_v25  ;;  %v1472_v11 = vshrl.u32 %v2841_v2, %v1466_v25  ;;  %v3557_v42 = vsub.s32 %v679_v16, %v682_v51 }
 0x197   : > { %2705 = vcosq.f32 %v1643_v59  ;;  %v1475_v45 = vshrl.u32 %v2842_v4, %v1466_v25  ;;  %v3563_v22 = vshll.u32 %v1459_v14, 8  ;;  %v1477_v36 = vshll.u32 %v2842_v4, %v1465_v53 }
 0x198   : > { %2707 = vsinq.f32 %v1643_v59  ;;  %v685_v38 = vsub.s32 0, %v3557_v42  ;;  %v1470_v43 = vor.u32 %v1469_v7, %v1468_v57  ;;  %v1473_v58 = vor.u32 %v1472_v11, %v1471_v1  ;;  %v3593_v11 = vpop.f32.mrb[7].mxu0 }
 0x199   : > { %v1476_v19 = vor.u32 %v1475_v45, %v1474_v17  ;;  %v1478_v48 = vshrl.u32 %v2843_v6, %v1466_v25  ;;  %v1480_v37 = vshll.u32 %v2843_v6, %v1465_v53  ;;  %v1481_v31 = vshrl.u32 %v2844_v13, %v1466_v25 }
 0x19a   : > { %vm1654_vm6 = vcmp.eq.s32.totalorder %v3540_v44, 2  ;;  %v2400_v3 = vmin.u32 %v685_v38, %v3557_v42  ;;  %v705_v9 = vsub.s32 4, %v3542_v39  ;;  %v3575_v62 = vand.u32 8388607, %v931_v26 }
 0x19b   : > { %v941_v15 = vadd.s32 1, %v2411_v49  ;;  %vm1651_vm7 = vcmp.eq.s32.totalorder %v3540_v44, 0  ;;  %v1467_v28 = vshrl.u32 %v2839_v60, %v1466_v25  ;;  %v1479_v63 = vor.u32 %v1478_v48, %v1477_v36 }
 0x19c   : > { %v1482_v16 = vor.u32 %v1481_v31, %v1480_v37  ;;  %vm1483_vm8 = vcmp.lt.s32.totalorder %v1464_v24, 1  ;;  %vm1650_vm9 = vcmp.lt.s32.totalorder %v3540_v44, 2  ;;  %vm621_vm10 = vcmp.lt.s32.totalorder %v3289_v12, 0 }
 0x19d   : > { %v687_v27 = vclz %v2400_v3  ;;  %vm1484_vm11 = vcmp.lt.s32.totalorder %v1464_v24, 2  ;;  %vm1485_vm12 = vcmp.lt.s32.totalorder %v1464_v24, 3  ;;  %vm1486_vm13 = vcmp.lt.s32.totalorder %v1464_v24, 4 }
 0x19e   : > { %vm1647_vm15 = vweird.f32 %v3280_v23  ;;  %v1488_v41 = vsel %vm1486_vm13, %v1476_v19, 2102212464  ;;  %v1491_v46 = vsel %vm1483_vm8, %v1470_v43, %v1473_v58  ;;  %v1492_v29 = vsel %vm1486_vm13, %v1479_v63, 920167782 }
 0x19f   : > { %v1495_v52 = vsel %vm1483_vm8, %v1473_v58, %v1476_v19  ;;  %v2401_v18 = vadd.s32 4294967294, %v687_v27  ;;  %v1487_v21 = vsel %vm1483_vm8, %v1467_v28, %v1470_v43  ;;  %v1493_v5 = vsel %vm1485_vm12, %v1476_v19, %v1492_v29 }
 0x1a0   : > { %v1496_v53 = vsel %vm1486_vm13, %v1482_v16, 1326507024  ;;  %v1489_v34 = vsel %vm1485_vm12, %v1473_v58, %v1488_v41  ;;  %v1494_v10 = vsel %vm1484_vm11, %v1491_v46, %v1493_v5  ;;  %vm942_vm0 = vcmp.gt.s32.totalorder %v941_v15, 0 }
 0x1a1   : > { %v1497_v61 = vsel %vm1485_vm12, %v1479_v63, %v1496_v53  ;;  %v2706_v14 = vpop.eup %2705  ;;  %vm2402_vm1 = vcmp.lt.s32.totalorder %v2401_v18, 0  ;;  %v3585_v20 = vmul.u32.u64.low %v3563_v22, %v1494_v10  ;;  %v3586_v51 = vmul.u32.u64.high %v3563_v22, %v1494_v10, %v3585_v20 }
 0x1a2   : > { %v1498_v25 = vsel %vm1484_vm11, %v1495_v52, %v1497_v61  ;;  %v2708_v57 = vpop.eup %2707  ;;  %v1655_v49 = vxor.u32 2147483648, %v2706_v14  ;;  %v690_v59 = vsel %vm2402_vm1, 0, %v2401_v18  ;;  %v1490_v43 = vsel %vm1484_vm11, %v1487_v21, %v1489_v34 }
 0x1a3   : > { %v3590_v7 = vmul.u32.u64.low %v3563_v22, %v1498_v25  ;;  %v3591_v1 = vmul.u32.u64.high %v3563_v22, %v1498_v25, %v3590_v7  ;;  %v1652_v17 = vxor.u32 2147483648, %v2708_v57  ;;  %v691_v45 = vsub.s32 32, %v690_v59 }
 0x1a4   : > { %v695_v38 = vsub.s32 4294967266, %v690_v59  ;;  %v1656_v58 = vsel %vm1654_vm6, %v1655_v49, %v2708_v57  ;;  %v692_v19 = vshll.u32 %v3557_v42, %v690_v59  ;;  %v939_v36 = vor.u32 8388608, %v3575_v62 }
 0x1a5   : > { %v943_v48 = vsel %vm942_vm0, %v941_v15, 0  ;;  %v1653_v37 = vsel %vm1651_vm7, %v2706_v14, %v1652_v17  ;;  %v693_v31 = vshrl.u32 %v675_v35, %v691_v45  ;;  %v1509_v28 = vadd.s32 1, %v3586_v51 }
 0x1a6   : > { %v696_v3 = vadd.s32 127, %v695_v38  ;;  %v1657_v24 = vsel %vm1650_vm9, %v1653_v37, %v1656_v58  ;;  %v706_v63 = vsel %vm621_vm10, %v705_v9, %v3542_v39  ;;  %v1506_v42 = vmul.u32 %v3563_v22, %v1490_v43 }
 0x1a7   : > { %vm1508_vm2 = vc.u32 %v3591_v1, %v3585_v20  ;;  %v1658_v62 = vsel %vm1647_vm15, nan, %v1657_v24  ;;  %v694_v15 = vor.u32 %v693_v31, %v692_v19  ;;  %vm3619_vm3 = vcmp.le.f32.partialorder %v619_v54, 0.7853982 }
 0x1a8   : > { %v697_v35 = vshll.u32 %v696_v3, 23  ;;  %v1510_v16 = vsel %vm1508_vm2, %v1509_v28, %v3586_v51  ;;  %2087 = vst.msk [vmem:[%s3243_s8 + $0x58] sm:$0xff] %vm2075_vm14, %v1658_v62  ;;  %v945_v22 = vand.u32 31, %v943_v48  ;;  %v708_v27 = vsel %vm3619_vm3, 0, %v706_v63 }
 0x1a9   : > { %v1511_v39 = vadd.s32 %v1510_v16, %v1506_v42  ;;  %v3625_v23 = vshll.u32 %v939_v36, 8  ;;  %v701_v41 = vcvt.s32.f32 %v694_v15  ;;  %v3627_v29 = vshrl.u32 %v943_v48, 5 }
 0x1aa   : > { %v698_v9 = vor.u32 4788187, %v697_v35  ;;  %v946_v52 = vsub.s32 32, %v945_v22  ;;  %v948_v21 = vshll.u32 %v2839_v60, %v945_v22  ;;  %v951_v54 = vshll.u32 %v2840_v0, %v945_v22 }
 0x1ab   : > { %v1512_v46 = vadd.s32 536870912, %v1511_v39  ;;  %v954_v5 = vshll.u32 %v2841_v2, %v945_v22  ;;  %v957_v61 = vshll.u32 %v2842_v4, %v945_v22  ;;  %v712_v49 = vadd.s32 3, %v708_v27 }
 0x1ac   : > { %v699_v18 = vand.u32 2147483647, %v698_v9  ;;  %v949_v34 = vshrl.u32 %v2840_v0, %v946_v52  ;;  %v952_v10 = vshrl.u32 %v2841_v2, %v946_v52  ;;  %v955_v25 = vshrl.u32 %v2842_v4, %v946_v52 }
 0x1ad   : > { %v1513_v53 = vshrl.u32 %v1512_v46, 30  ;;  %v958_v51 = vshrl.u32 %v2843_v6, %v946_v52  ;;  %v961_v57 = vshrl.u32 %v2844_v13, %v946_v52  ;;  %v960_v58 = vshll.u32 %v2843_v6, %v945_v22 }
 0x1ae   : > { %v702_v14 = vmul.f32 %v701_v41, %v699_v18  ;;  %v950_v7 = vor.u32 %v949_v34, %v948_v21  ;;  %v953_v17 = vor.u32 %v952_v10, %v951_v54  ;;  %v956_v38 = vor.u32 %v955_v25, %v954_v5  ;;  %v3676_v41 = vpop.f32.mrb[7].mxu1 }
 0x1af   : > { %v1514_v59 = vshll.u32 %v1513_v53, 30  ;;  %v959_v43 = vor.u32 %v958_v51, %v957_v61  ;;  %vm963_vm4 = vcmp.lt.s32.totalorder %v3627_v29, 1  ;;  %vm966_vm5 = vcmp.lt.s32.totalorder %v3627_v29, 4 }
 0x1b0   : > { %v703_v45 = vxor.u32 2147483648, %v702_v14  ;;  %v3645_v36 = vadd.f32 %v3461_v8, %v3120_v30  ;;  %v962_v37 = vor.u32 %v961_v57, %v960_v58  ;;  %v971_v31 = vsel %vm963_vm4, %v950_v7, %v953_v17 }
 0x1b1   : > { %v3639_v19 = vsub.s32 %v1511_v39, %v1514_v59  ;;  %v972_v3 = vsel %vm966_vm5, %v959_v43, 920167782  ;;  %vm964_vm6 = vcmp.lt.s32.totalorder %v3627_v29, 2  ;;  %vm965_vm7 = vcmp.lt.s32.totalorder %v3627_v29, 3 }
 0x1b2   : > { %v704_v48 = vsel %vm621_vm10, %v703_v45, %v702_v14  ;;  %v1537_v30 = vsub.s32 4, %v1513_v53  ;;  %v947_v63 = vshrl.u32 %v2839_v60, %v946_v52  ;;  %v973_v42 = vsel %vm965_vm7, %v956_v38, %v972_v3 }
 0x1b3   : > { %v707_v28 = vsel %vm3619_vm3, %v3289_v12, %v704_v48  ;;  %v1517_v24 = vsub.s32 0, %v3639_v19  ;;  %v968_v15 = vsel %vm966_vm5, %v956_v38, 2102212464  ;;  %v974_v35 = vsel %vm964_vm6, %v971_v31, %v973_v42 }
 0x1b4   : > { %2709 = vcosq.f32 %v707_v28  ;;  %v975_v16 = vsel %vm963_vm4, %v953_v17, %v956_v38  ;;  %v976_v44 = vsel %vm966_vm5, %v962_v37, 1326507024  ;;  %v713_v9 = vand.u32 3, %v712_v49 }
 0x1b5   : > { %2711 = vsinq.f32 %v707_v28  ;;  %v2432_v62 = vmin.u32 %v1517_v24, %v3639_v19  ;;  %v3672_v39 = vmul.u32.u64.low %v3625_v23, %v974_v35  ;;  %v3673_v22 = vmul.u32.u64.high %v3625_v23, %v974_v35, %v3672_v39 }
 0x1b6   : > { %v967_v46 = vsel %vm963_vm4, %v947_v63, %v950_v7  ;;  %v969_v52 = vsel %vm965_vm7, %v953_v17, %v968_v15  ;;  %v977_v18 = vsel %vm965_vm7, %v959_v43, %v976_v44  ;;  %v1766_v21 = vand.u32 2139095040, %v3645_v36 }
 0x1b7   : > { %v1519_v27 = vclz %v2432_v62  ;;  %vm3687_vm8 = vcmp.le.f32.partialorder %v1451_v55, 0.7853982  ;;  %vm1453_vm9 = vcmp.lt.s32.totalorder %v3465_v56, 0  ;;  %v978_v34 = vsel %vm964_vm6, %v975_v16, %v977_v18 }
 0x1b8   : > { %v1538_v10 = vsel %vm1453_vm9, %v1537_v30, %v1513_v53  ;;  %v3697_v61 = vmul.u32.u64.low %v3625_v23, %v978_v34  ;;  %v3698_v14 = vmul.u32.u64.high %v3625_v23, %v978_v34, %v3697_v61  ;;  %v1763_v25 = vand.u32 2147483647, %v3645_v36 }
 0x1b9   : > { %v2433_v5 = vadd.s32 4294967294, %v1519_v27  ;;  %vm711_vm10 = vweird.f32 %v3289_v12  ;;  %v970_v55 = vsel %vm964_vm6, %v967_v46, %v969_v52  ;;  %v989_v51 = vadd.s32 1, %v3673_v22 }
 0x1ba   : > { %v1767_v57 = vshrl.u32 %v1766_v21, 23  ;;  %vm714_vm12 = vcmp.lt.s32.totalorder %v713_v9, 2  ;;  %vm718_vm13 = vcmp.eq.s32.totalorder %v713_v9, 2  ;;  %v1507_v53 = vadd.s32 %v3585_v20, %v3591_v1 }
 0x1bb   : > { %vm2434_vm11 = vcmp.lt.s32.totalorder %v2433_v5, 0  ;;  %v1540_v17 = vsel %vm3687_vm8, 0, %v1538_v10  ;;  %v986_v29 = vmul.u32 %v3625_v23, %v970_v55  ;;  %vm988_vm15 = vc.u32 %v3698_v14, %v3672_v39 }
 0x1bc   : > { %v1522_v49 = vsel %vm2434_vm11, 0, %v2433_v5  ;;  %v2443_v45 = vadd.s32 4294967169, %v1767_v57  ;;  %v1770_v58 = vand.u32 8388607, %v1763_v25  ;;  %v990_v31 = vsel %vm988_vm15, %v989_v51, %v3673_v22 }
 0x1bd   : > { %v1523_v59 = vsub.s32 32, %v1522_v49  ;;  %v1527_v7 = vsub.s32 4294967266, %v1522_v49  ;;  %v1524_v43 = vshll.u32 %v3639_v19, %v1522_v49  ;;  %v991_v28 = vadd.s32 %v990_v31, %v986_v29 }
 0x1be   : > { %v2710_v38 = vpop.eup %2709  ;;  %v1773_v24 = vadd.s32 1, %v2443_v45  ;;  %v3718_v19 = vadd.f32 %v3461_v8, %v3253_v40  ;;  %vm715_vm0 = vcmp.eq.s32.totalorder %v713_v9, 0  ;;  %v1544_v62 = vadd.s32 3, %v1540_v17 }
 0x1bf   : > { %v2712_v48 = vpop.eup %2711  ;;  %v719_v20 = vxor.u32 2147483648, %v2710_v38  ;;  %v1525_v1 = vshrl.u32 %v1507_v53, %v1523_v59  ;;  %v1528_v37 = vadd.s32 127, %v1527_v7  ;;  %v992_v15 = vadd.s32 536870912, %v991_v28 }
 0x1c0   : > { %v716_v3 = vxor.u32 2147483648, %v2712_v48  ;;  %vm1774_vm1 = vcmp.gt.s32.totalorder %v1773_v24, 0  ;;  %v1771_v44 = vor.u32 8388608, %v1770_v58  ;;  %v830_v52 = vand.u32 2139095040, %v3718_v19 }
 0x1c1   : > { %v720_v23 = vsel %vm718_vm13, %v719_v20, %v2712_v48  ;;  %v1526_v30 = vor.u32 %v1525_v1, %v1524_v43  ;;  %v1529_v63 = vshll.u32 %v1528_v37, 23  ;;  %v1775_v22 = vsel %vm1774_vm1, %v1773_v24, 0 }
 0x1c2   : > { %v717_v42 = vsel %vm715_vm0, %v2710_v38, %v716_v3  ;;  %v993_v40 = vshrl.u32 %v992_v15, 30  ;;  %v1777_v46 = vand.u32 31, %v1775_v22  ;;  %vm933_vm2 = vcmp.lt.s32.totalorder %v3469_v33, 0 }
 0x1c3   : > { %v721_v35 = vsel %vm714_vm12, %v717_v42, %v720_v23  ;;  %v1530_v16 = vor.u32 4788187, %v1529_v63  ;;  %v1533_v21 = vcvt.s32.f32 %v1526_v30  ;;  %v3728_v5 = vand.u32 3, %v1544_v62 }
 0x1c4   : > { %v722_v27 = vsel %vm711_vm10, nan, %v721_v35  ;;  %vm3732_vm3 = vcmp.le.f32.partialorder %v931_v26, 0.7853982  ;;  %v994_v12 = vshll.u32 %v993_v40, 30  ;;  %v1778_v34 = vsub.s32 32, %v1777_v46 }
 0x1c5   : > { %2078 = vst.msk [vmem:[%s3243_s8 + $0x10] sm:$0xff] %vm2075_vm14, %v722_v27  ;;  %v1531_v18 = vand.u32 2147483647, %v1530_v16  ;;  %v827_v10 = vand.u32 2147483647, %v3718_v19  ;;  %v987_v55 = vadd.s32 %v3672_v39, %v3698_v14  ;;  %v1017_v51 = vsub.s32 4, %v993_v40 }
 0x1c6   : > { %v3739_v57 = vshll.u32 %v1771_v44, 8  ;;  %v3741_v53 = vsub.s32 %v991_v28, %v994_v12  ;;  %v3743_v49 = vshrl.u32 %v1775_v22, 5  ;;  %v1781_v26 = vshrl.u32 %v2840_v0, %v1778_v34 }
 0x1c7   : > { %v1534_v61 = vmul.f32 %v1533_v21, %v1531_v18  ;;  %v831_v59 = vshrl.u32 %v830_v52, 23  ;;  %v1780_v17 = vshll.u32 %v2839_v60, %v1777_v46  ;;  %v1784_v45 = vshrl.u32 %v2841_v2, %v1778_v34 }
 0x1c8   : > { %v1787_v38 = vshrl.u32 %v2842_v4, %v1778_v34  ;;  %v997_v43 = vsub.s32 0, %v3741_v53  ;;  %v1783_v39 = vshll.u32 %v2840_v0, %v1777_v46  ;;  %v1786_v14 = vshll.u32 %v2841_v2, %v1777_v46 }
 0x1c9   : > { %v1535_v7 = vxor.u32 2147483648, %v1534_v61  ;;  %v1790_v29 = vshrl.u32 %v2843_v6, %v1778_v34  ;;  %v1018_v48 = vsel %vm933_vm2, %v1017_v51, %v993_v40  ;;  %v1782_v20 = vor.u32 %v1781_v26, %v1780_v17 }
 0x1ca   : > { %v1789_v1 = vshll.u32 %v2842_v4, %v1777_v46  ;;  %v2412_v31 = vmin.u32 %v997_v43, %v3741_v53  ;;  %v1785_v3 = vor.u32 %v1784_v45, %v1783_v39  ;;  %v1788_v28 = vor.u32 %v1787_v38, %v1786_v14 }
 0x1cb   : > { %v1536_v58 = vsel %vm1453_vm9, %v1535_v7, %v1534_v61  ;;  %v1792_v23 = vshll.u32 %v2843_v6, %v1777_v46  ;;  %v1793_v30 = vshrl.u32 %v2844_v13, %v1778_v34  ;;  %v2407_v42 = vadd.s32 4294967169, %v831_v59 }
 0x1cc   : > { %v1539_v37 = vsel %vm3687_vm8, %v3465_v56, %v1536_v58  ;;  %v1791_v24 = vor.u32 %v1790_v29, %v1789_v1  ;;  %v999_v63 = vclz %v2412_v31  ;;  %v3766_v62 = vand.u32 8388607, %v827_v10 }
 0x1cd   : > { %2713 = vcosq.f32 %v1539_v37  ;;  %v1020_v54 = vsel %vm3732_vm3, 0, %v1018_v48  ;;  %v1779_v15 = vshrl.u32 %v2839_v60, %v1778_v34  ;;  %v1794_v35 = vor.u32 %v1793_v30, %v1792_v23 }
 0x1ce   : > { %2715 = vsinq.f32 %v1539_v37  ;;  %vm1795_vm4 = vcmp.lt.s32.totalorder %v3743_v49, 1  ;;  %v2413_v16 = vadd.s32 4294967294, %v999_v63  ;;  %vm1797_vm5 = vcmp.lt.s32.totalorder %v3743_v49, 3 }
 0x1cf   : > { %vm1798_vm6 = vcmp.lt.s32.totalorder %v3743_v49, 4  ;;  %v1803_v44 = vsel %vm1795_vm4, %v1782_v20, %v1785_v3  ;;  %v1807_v40 = vsel %vm1795_vm4, %v1785_v3, %v1788_v28  ;;  %vm1796_vm8 = vcmp.lt.s32.totalorder %v3743_v49, 2 }
 0x1d0   : > { %v1800_v22 = vsel %vm1798_vm6, %v1788_v28, 2102212464  ;;  %v1804_v27 = vsel %vm1798_vm6, %v1791_v24, 920167782  ;;  %v1808_v46 = vsel %vm1798_vm6, %v1794_v35, 1326507024  ;;  %v1799_v12 = vsel %vm1795_vm4, %v1779_v15, %v1782_v20 }
 0x1d1   : > { %vm2414_vm7 = vcmp.lt.s32.totalorder %v2413_v16, 0  ;;  %v1805_v52 = vsel %vm1797_vm5, %v1788_v28, %v1804_v27  ;;  %v1809_v18 = vsel %vm1797_vm5, %v1791_v24, %v1808_v46  ;;  %vm1546_vm9 = vcmp.lt.s32.totalorder %v3728_v5, 2 }
 0x1d2   : > { %v1002_v21 = vsel %vm2414_vm7, 0, %v2413_v16  ;;  %v1806_v34 = vsel %vm1796_vm8, %v1803_v44, %v1805_v52  ;;  %v1810_v61 = vsel %vm1796_vm8, %v1807_v40, %v1809_v18  ;;  %vm1543_vm10 = vweird.f32 %v3465_v56 }
 0x1d3   : > { %v1003_v51 = vsub.s32 32, %v1002_v21  ;;  %v1007_v26 = vsub.s32 4294967266, %v1002_v21  ;;  %v1801_v59 = vsel %vm1797_vm5, %v1785_v3, %v1800_v22  ;;  %v837_v7 = vadd.s32 1, %v2407_v42 }
 0x1d4   : > { %v3788_v17 = vmul.u32.u64.low %v3739_v57, %v1810_v61  ;;  %v3789_v45 = vmul.u32.u64.high %v3739_v57, %v1810_v61, %v3788_v17  ;;  %v3792_v38 = vmul.u32.u64.low %v3739_v57, %v1806_v34  ;;  %v3793_v43 = vmul.u32.u64.high %v3739_v57, %v1806_v34, %v3792_v38 }
 0x1d5   : > { %v1004_v39 = vshll.u32 %v3741_v53, %v1002_v21  ;;  %v1005_v14 = vshrl.u32 %v987_v55, %v1003_v51  ;;  %v1008_v29 = vadd.s32 127, %v1007_v26  ;;  %vm838_vm11 = vcmp.gt.s32.totalorder %v837_v7, 0 }
 0x1d6   : > { %vm1547_vm12 = vcmp.eq.s32.totalorder %v3728_v5, 0  ;;  %vm1550_vm13 = vcmp.eq.s32.totalorder %v3728_v5, 2  ;;  %v1802_v48 = vsel %vm1796_vm8, %v1799_v12, %v1801_v59  ;;  %v839_v20 = vsel %vm838_vm11, %v837_v7, 0 }
 0x1d7   : > { %v2714_v58 = vpop.eup %2713  ;;  %v1006_v31 = vor.u32 %v1005_v14, %v1004_v39  ;;  %v1009_v3 = vshll.u32 %v1008_v29, 23  ;;  %v835_v28 = vor.u32 8388608, %v3766_v62  ;;  %v1024_v53 = vadd.s32 3, %v1020_v54 }
 0x1d8   : > { %v2716_v1 = vpop.eup %2715  ;;  %v1551_v37 = vxor.u32 2147483648, %v2714_v58  ;;  %vm1820_vm15 = vc.u32 %v3789_v45, %v3792_v38  ;;  %v1821_v55 = vadd.s32 1, %v3793_v43  ;;  %v1818_v49 = vmul.u32 %v3739_v57, %v1802_v48 }
 0x1d9   : > { %v1548_v24 = vxor.u32 2147483648, %v2716_v1  ;;  %v1010_v30 = vor.u32 4788187, %v1009_v3  ;;  %v841_v63 = vand.u32 31, %v839_v20  ;;  %v1013_v15 = vcvt.s32.f32 %v1006_v31 }
 0x1da   : > { %v1552_v23 = vsel %vm1550_vm13, %v1551_v37, %v2716_v1  ;;  %v1822_v35 = vsel %vm1820_vm15, %v1821_v55, %v3793_v43  ;;  %v3811_v62 = vadd.f32 %v3461_v8, %v3321_v47  ;;  %v3817_v27 = vand.u32 3, %v1024_v53 }
 0x1db   : > { %v1549_v42 = vsel %vm1547_vm12, %v2714_v58, %v1548_v24  ;;  %v1011_v16 = vand.u32 2147483647, %v1010_v30  ;;  %v1823_v44 = vadd.s32 %v1822_v35, %v1818_v49  ;;  %v842_v22 = vsub.s32 32, %v841_v63 }
 0x1dc   : > { %v1553_v54 = vsel %vm1546_vm9, %v1549_v42, %v1552_v23  ;;  %v840_v40 = vshrl.u32 %v839_v20, 5  ;;  %v844_v46 = vshll.u32 %v2839_v60, %v841_v63  ;;  %v847_v5 = vshll.u32 %v2840_v0, %v841_v63 }
 0x1dd   : > { %v1554_v57 = vsel %vm1543_vm10, nan, %v1553_v54  ;;  %v1014_v52 = vmul.f32 %v1013_v15, %v1011_v16  ;;  %v1824_v18 = vadd.s32 536870912, %v1823_v44  ;;  %v845_v47 = vshrl.u32 %v2840_v0, %v842_v22 }
 0x1de   : > { %2086 = vst.msk [vmem:[%s3243_s8 + $0x50] sm:$0xff] %vm2075_vm14, %v1554_v57  ;;  %v848_v21 = vshrl.u32 %v2841_v2, %v842_v22  ;;  %v850_v12 = vshll.u32 %v2841_v2, %v841_v63  ;;  %v851_v56 = vshrl.u32 %v2842_v4, %v842_v22  ;;  %v854_v34 = vshrl.u32 %v2843_v6, %v842_v22 }
 0x1df   : > { %v1015_v61 = vxor.u32 2147483648, %v1014_v52  ;;  %v1825_v51 = vshrl.u32 %v1824_v18, 30  ;;  %v846_v26 = vor.u32 %v845_v47, %v844_v46  ;;  %v853_v59 = vshll.u32 %v2842_v4, %v841_v63 }
 0x1e0   : > { %v849_v7 = vor.u32 %v848_v21, %v847_v5  ;;  %v852_v17 = vor.u32 %v851_v56, %v850_v12  ;;  %v856_v43 = vshll.u32 %v2843_v6, %v841_v63  ;;  %v857_v39 = vshrl.u32 %v2844_v13, %v842_v22 }
 0x1e1   : > { %v1016_v14 = vsel %vm933_vm2, %v1015_v61, %v1014_v52  ;;  %v1826_v29 = vshll.u32 %v1825_v51, 30  ;;  %v855_v58 = vor.u32 %v854_v34, %v853_v59  ;;  %v3833_v48 = vshll.u32 %v835_v28, 8 }
 0x1e2   : > { %v1019_v20 = vsel %vm3732_vm3, %v3469_v33, %v1016_v14  ;;  %v858_v1 = vor.u32 %v857_v39, %v856_v43  ;;  %vm859_vm0 = vcmp.lt.s32.totalorder %v840_v40, 1  ;;  %v1662_v37 = vand.u32 2139095040, %v3811_v62 }
 0x1e3   : > { %2717 = vcosq.f32 %v1019_v20  ;;  %v3839_v31 = vsub.s32 %v1823_v44, %v1826_v29  ;;  %vm860_vm1 = vcmp.lt.s32.totalorder %v840_v40, 2  ;;  %vm862_vm4 = vcmp.lt.s32.totalorder %v840_v40, 4 }
 0x1e4   : > { %2719 = vsinq.f32 %v1019_v20  ;;  %v843_v3 = vshrl.u32 %v2839_v60, %v842_v22  ;;  %v864_v24 = vsel %vm862_vm4, %v852_v17, 2102212464  ;;  %v867_v28 = vsel %vm859_vm0, %v846_v26, %v849_v7 }
 0x1e5   : > { %v1829_v53 = vsub.s32 0, %v3839_v31  ;;  %v1849_v55 = vsub.s32 4, %v1825_v51  ;;  %vm861_vm2 = vcmp.lt.s32.totalorder %v840_v40, 3  ;;  %v868_v9 = vsel %vm862_vm4, %v855_v58, 920167782 }
 0x1e6   : > { %v863_v23 = vsel %vm859_vm0, %v843_v3, %v846_v26  ;;  %v869_v30 = vsel %vm861_vm2, %v852_v17, %v868_v9  ;;  %v871_v49 = vsel %vm859_vm0, %v849_v7, %v852_v17  ;;  %v872_v63 = vsel %vm862_vm4, %v858_v1, 1326507024 }
 0x1e7   : > { %v2444_v42 = vmin.u32 %v1829_v53, %v3839_v31  ;;  %v865_v15 = vsel %vm861_vm2, %v849_v7, %v864_v24  ;;  %v870_v35 = vsel %vm860_vm1, %v867_v28, %v869_v30  ;;  %v873_v54 = vsel %vm861_vm2, %v855_v58, %v872_v63 }
 0x1e8   : > { %vm1765_vm3 = vcmp.lt.s32.totalorder %v3645_v36, 0  ;;  %v874_v16 = vsel %vm860_vm1, %v871_v49, %v873_v54  ;;  %v3851_v44 = vmul.u32.u64.low %v3833_v48, %v870_v35  ;;  %v3852_v22 = vmul.u32.u64.high %v3833_v48, %v870_v35, %v3851_v44 }
 0x1e9   : > { %v1831_v57 = vclz %v2444_v42  ;;  %v1850_v46 = vsel %vm1765_vm3, %v1849_v55, %v1825_v51  ;;  %v1659_v52 = vand.u32 2147483647, %v3811_v62  ;;  %v866_v18 = vsel %vm860_vm1, %v863_v23, %v865_v15 }
 0x1ea   : > { %v3859_v47 = vmul.u32.u64.low %v3833_v48, %v874_v16  ;;  %v3860_v5 = vmul.u32.u64.high %v3833_v48, %v874_v16, %v3859_v47  ;;  %v1663_v21 = vshrl.u32 %v1662_v37, 23  ;;  %vm1026_vm5 = vcmp.lt.s32.totalorder %v3817_v27, 2 }
 0x1eb   : > { %vm3865_vm6 = vcmp.le.f32.partialorder %v1763_v25, 0.7853982  ;;  %v2445_v56 = vadd.s32 4294967294, %v1831_v57  ;;  %v3871_v34 = vadd.f32 %v3461_v8, %v3449_v50  ;;  %vm1027_vm7 = vcmp.eq.s32.totalorder %v3817_v27, 0 }
 0x1ec   : > { %vm1030_vm8 = vcmp.eq.s32.totalorder %v3817_v27, 2  ;;  %v885_v40 = vadd.s32 1, %v3852_v22  ;;  %v2439_v61 = vadd.s32 4294967169, %v1663_v21  ;;  %v1819_v26 = vadd.s32 %v3792_v38, %v3789_v45 }
 0x1ed   : > { %v2718_v51 = vpop.eup %2717  ;;  %vm2446_vm9 = vcmp.lt.s32.totalorder %v2445_v56, 0  ;;  %v1852_v25 = vsel %vm3865_vm6, 0, %v1850_v46  ;;  %v882_v59 = vmul.u32 %v3833_v48, %v866_v18  ;;  %vm884_vm10 = vc.u32 %v3860_v5, %v3851_v44 }
 0x1ee   : > { %v2720_v7 = vpop.eup %2719  ;;  %v1031_v50 = vxor.u32 2147483648, %v2718_v51  ;;  %v1834_v8 = vsel %vm2446_vm9, 0, %v2445_v56  ;;  %v1666_v17 = vand.u32 8388607, %v1659_v52  ;;  %v1142_v29 = vand.u32 2139095040, %v3871_v34 }
 0x1ef   : > { %v1028_v43 = vxor.u32 2147483648, %v2720_v7  ;;  %v1835_v39 = vsub.s32 32, %v1834_v8  ;;  %v1839_v14 = vsub.s32 4294967266, %v1834_v8  ;;  %v1836_v38 = vshll.u32 %v3839_v31, %v1834_v8 }
 0x1f0   : > { %v1032_v45 = vsel %vm1030_vm8, %v1031_v50, %v2720_v7  ;;  %v886_v58 = vsel %vm884_vm10, %v885_v40, %v3852_v22  ;;  %v1669_v48 = vadd.s32 1, %v2439_v61  ;;  %vm1023_vm11 = vweird.f32 %v3469_v33 }
 0x1f1   : > { %v1029_v20 = vsel %vm1027_vm7, %v2718_v51, %v1028_v43  ;;  %v1837_v1 = vshrl.u32 %v1819_v26, %v1835_v39  ;;  %v1840_v37 = vadd.s32 127, %v1839_v14  ;;  %v887_v3 = vadd.s32 %v886_v58, %v882_v59 }
 0x1f2   : > { %v1033_v24 = vsel %vm1026_vm5, %v1029_v20, %v1032_v45  ;;  %v1856_v28 = vadd.s32 3, %v1852_v25  ;;  %vm1670_vm12 = vcmp.gt.s32.totalorder %v1669_v48, 0  ;;  %v1667_v23 = vor.u32 8388608, %v1666_v17 }
 0x1f3   : > { %v1034_v53 = vsel %vm1023_vm11, nan, %v1033_v24  ;;  %v1838_v55 = vor.u32 %v1837_v1, %v1836_v38  ;;  %v1841_v9 = vshll.u32 %v1840_v37, 23  ;;  %v888_v31 = vadd.s32 536870912, %v887_v3 }
 0x1f4   : > { %2081 = vst.msk [vmem:[%s3243_s8 + $0x28] sm:$0xff] %vm2075_vm14, %v1034_v53  ;;  %v1671_v30 = vsel %vm1670_vm12, %v1669_v48, 0  ;;  %v1143_v42 = vshrl.u32 %v1142_v29, 23  ;;  %v3896_v33 = vand.u32 3, %v1856_v28  ;;  %vm829_vm13 = vcmp.lt.s32.totalorder %v3718_v19, 0 }
 0x1f5   : > { %v1842_v49 = vor.u32 4788187, %v1841_v9  ;;  %v889_v63 = vshrl.u32 %v888_v31, 30  ;;  %v1673_v15 = vand.u32 31, %v1671_v30  ;;  %v1845_v54 = vcvt.s32.f32 %v1838_v55 }
 0x1f6   : > { %v883_v16 = vadd.s32 %v3851_v44, %v3860_v5  ;;  %v3900_v57 = vshll.u32 %v1667_v23, 8  ;;  %v1139_v46 = vand.u32 2147483647, %v3871_v34  ;;  %v1672_v21 = vshrl.u32 %v1671_v30, 5 }
 0x1f7   : > { %v1843_v35 = vand.u32 2147483647, %v1842_v49  ;;  %v890_v27 = vshll.u32 %v889_v63, 30  ;;  %v1674_v22 = vsub.s32 32, %v1673_v15  ;;  %v2419_v56 = vadd.s32 4294967169, %v1143_v42 }
 0x1f8   : > { %v913_v40 = vsub.s32 4, %v889_v63  ;;  %v1676_v61 = vshll.u32 %v2839_v60, %v1673_v15  ;;  %vm3910_vm15 = vcmp.le.f32.partialorder %v827_v10, 0.7853982  ;;  %v1679_v59 = vshll.u32 %v2840_v0, %v1673_v15 }
 0x1f9   : > { %v1846_v18 = vmul.f32 %v1845_v54, %v1843_v35  ;;  %v3903_v47 = vsub.s32 %v887_v3, %v890_v27  ;;  %v1677_v51 = vshrl.u32 %v2840_v0, %v1674_v22  ;;  %v1680_v26 = vshrl.u32 %v2841_v2, %v1674_v22 }
 0x1fa   : > { %v1683_v7 = vshrl.u32 %v2842_v4, %v1674_v22  ;;  %v1682_v8 = vshll.u32 %v2841_v2, %v1673_v15  ;;  %v1685_v17 = vshll.u32 %v2842_v4, %v1673_v15  ;;  %v1686_v43 = vshrl.u32 %v2843_v6, %v1674_v22 }
 0x1fb   : > { %v1847_v25 = vxor.u32 2147483648, %v1846_v18  ;;  %v893_v5 = vsub.s32 0, %v3903_v47  ;;  %v1678_v50 = vor.u32 %v1677_v51, %v1676_v61  ;;  %v1681_v14 = vor.u32 %v1680_v26, %v1679_v59 }
 0x1fc   : > { %v1688_v29 = vshll.u32 %v2843_v6, %v1673_v15  ;;  %v1684_v38 = vor.u32 %v1683_v7, %v1682_v8  ;;  %v1687_v58 = vor.u32 %v1686_v43, %v1685_v17  ;;  %v1689_v48 = vshrl.u32 %v2844_v13, %v1674_v22 }
 0x1fd   : > { %v1848_v39 = vsel %vm1765_vm3, %v1847_v25, %v1846_v18  ;;  %v2408_v10 = vmin.u32 %v893_v5, %v3903_v47  ;;  %vm1691_vm0 = vcmp.lt.s32.totalorder %v1672_v21, 1  ;;  %v1149_v1 = vadd.s32 1, %v2419_v56 }
 0x1fe   : > { %v1851_v45 = vsel %vm3865_vm6, %v3645_v36, %v1848_v39  ;;  %v914_v37 = vsel %vm829_vm13, %v913_v40, %v889_v63  ;;  %v1675_v3 = vshrl.u32 %v2839_v60, %v1674_v22  ;;  %v1690_v24 = vor.u32 %v1689_v48, %v1688_v29 }
 0x1ff   : > { %2721 = vcosq.f32 %v1851_v45  ;;  %v895_v20 = vclz %v2408_v10  ;;  %vm1693_vm1 = vcmp.lt.s32.totalorder %v1672_v21, 3  ;;  %vm1694_vm4 = vcmp.lt.s32.totalorder %v1672_v21, 4 }
 0x200   : > { %2723 = vsinq.f32 %v1851_v45  ;;  %v1699_v12 = vsel %vm1691_vm0, %v1678_v50, %v1681_v14  ;;  %v1696_v53 = vsel %vm1694_vm4, %v1684_v38, 2102212464  ;;  %v1700_v55 = vsel %vm1694_vm4, %v1687_v58, 920167782 }
 0x201   : > { %v2409_v28 = vadd.s32 4294967294, %v895_v20  ;;  %v1703_v9 = vsel %vm1691_vm0, %v1681_v14, %v1684_v38  ;;  %v1704_v31 = vsel %vm1694_vm4, %v1690_v24, 1326507024  ;;  %vm1692_vm3 = vcmp.lt.s32.totalorder %v1672_v21, 2  ;;  %v3966_v20 = vld [vmem:[%s4363_s2] ss:$0 sm:$0xff] }
 0x202   : > { %v1701_v23 = vsel %vm1693_vm1, %v1684_v38, %v1700_v55  ;;  %v1705_v30 = vsel %vm1693_vm1, %v1687_v58, %v1704_v31  ;;  %v916_v63 = vsel %vm3910_vm15, 0, %v914_v37  ;;  %vm1858_vm5 = vcmp.lt.s32.totalorder %v3896_v33, 2 }
 0x203   : > { %vm2410_vm2 = vcmp.lt.s32.totalorder %v2409_v28, 0  ;;  %v1702_v42 = vsel %vm1692_vm3, %v1699_v12, %v1701_v23  ;;  %v1706_v15 = vsel %vm1692_vm3, %v1703_v9, %v1705_v30  ;;  %v1695_v27 = vsel %vm1691_vm0, %v1675_v3, %v1678_v50 }
 0x204   : > { %v898_v49 = vsel %vm2410_vm2, 0, %v2409_v28  ;;  %v1697_v22 = vsel %vm1693_vm1, %v1681_v14, %v1696_v53  ;;  %vm1855_vm6 = vweird.f32 %v3645_v36  ;;  %vm1150_vm7 = vcmp.gt.s32.totalorder %v1149_v1, 0 }
 0x205   : > { %v899_v35 = vsub.s32 32, %v898_v49  ;;  %v903_v54 = vsub.s32 4294967266, %v898_v49  ;;  %v3944_v18 = vmul.u32.u64.low %v3900_v57, %v1706_v15  ;;  %v3945_v56 = vmul.u32.u64.high %v3900_v57, %v1706_v15, %v3944_v18 }
 0x206   : > { %v3948_v40 = vmul.u32.u64.low %v3900_v57, %v1702_v42  ;;  %v3949_v61 = vmul.u32.u64.high %v3900_v57, %v1702_v42, %v3948_v40  ;;  %v900_v51 = vshll.u32 %v3903_v47, %v898_v49  ;;  %vm1859_vm8 = vcmp.eq.s32.totalorder %v3896_v33, 0 }
 0x207   : > { %v901_v26 = vshrl.u32 %v883_v16, %v899_v35  ;;  %v904_v25 = vadd.s32 127, %v903_v54  ;;  %v1698_v5 = vsel %vm1692_vm3, %v1695_v27, %v1697_v22  ;;  %v1146_v59 = vand.u32 8388607, %v1139_v46 }
 0x208   : > { %v1151_v7 = vsel %vm1150_vm7, %v1149_v1, 0  ;;  %vm1862_vm9 = vcmp.eq.s32.totalorder %v3896_v33, 2  ;;  %v920_v47 = vadd.s32 3, %v916_v63  ;;  %vm1716_vm10 = vc.u32 %v3945_v56, %v3948_v40 }
 0x209   : > { %v2722_v50 = vpop.eup %2721  ;;  %v902_v8 = vor.u32 %v901_v26, %v900_v51  ;;  %v905_v17 = vshll.u32 %v904_v25, 23  ;;  %v1153_v43 = vand.u32 31, %v1151_v7  ;;  %v1717_v16 = vadd.s32 1, %v3949_v61 }
 0x20a   : > { %v2724_v39 = vpop.eup %2723  ;;  %v1863_v10 = vxor.u32 2147483648, %v2722_v50  ;;  %v1714_v29 = vmul.u32 %v3900_v57, %v1698_v5  ;;  %v1147_v48 = vor.u32 8388608, %v1146_v59  ;;  %v3970_v1 = vadd.f32 %v3966_v20, %v3499_v32 }
 0x20b   : > { %v1860_v21 = vxor.u32 2147483648, %v2724_v39  ;;  %v906_v14 = vor.u32 4788187, %v905_v17  ;;  %v1154_v45 = vsub.s32 32, %v1153_v43  ;;  %v1718_v58 = vsel %vm1716_vm10, %v1717_v16, %v3949_v61 }
 0x20c   : > { %v1864_v38 = vsel %vm1862_vm9, %v1863_v10, %v2724_v39  ;;  %v909_v57 = vcvt.s32.f32 %v902_v8  ;;  %v1719_v24 = vadd.s32 %v1718_v58, %v1714_v29  ;;  %v3976_v12 = vand.u32 3, %v920_v47 }
 0x20d   : > { %v1861_v37 = vsel %vm1859_vm8, %v2722_v50, %v1860_v21  ;;  %v907_v3 = vand.u32 2147483647, %v906_v14  ;;  %v1157_v53 = vshrl.u32 %v2840_v0, %v1154_v45  ;;  %v1160_v55 = vshrl.u32 %v2841_v2, %v1154_v45 }
 0x20e   : > { %v1865_v28 = vsel %vm1858_vm5, %v1861_v37, %v1864_v38  ;;  %v1720_v31 = vadd.s32 536870912, %v1719_v24  ;;  %v1152_v23 = vshrl.u32 %v1151_v7, 5  ;;  %vm1661_vm11 = vcmp.lt.s32.totalorder %v3811_v62, 0 }
 0x20f   : > { %v1866_v9 = vsel %vm1855_vm6, nan, %v1865_v28  ;;  %v910_v32 = vmul.f32 %v909_v57, %v907_v3  ;;  %v1156_v30 = vshll.u32 %v2839_v60, %v1153_v43  ;;  %v1159_v33 = vshll.u32 %v2840_v0, %v1153_v43 }
 0x210   : > { %2089 = vst.msk [vmem:[%s3243_s8 + $0x68] sm:$0xff] %vm2075_vm14, %v1866_v9  ;;  %v1163_v49 = vshrl.u32 %v2842_v4, %v1154_v45  ;;  %v1166_v63 = vshrl.u32 %v2843_v6, %v1154_v45  ;;  %v1721_v15 = vshrl.u32 %v1720_v31, 30  ;;  %v1162_v36 = vshll.u32 %v2841_v2, %v1153_v43 }
 0x211   : > { %v911_v42 = vxor.u32 2147483648, %v910_v32  ;;  %v1165_v35 = vshll.u32 %v2842_v4, %v1153_v43  ;;  %v1158_v54 = vor.u32 %v1157_v53, %v1156_v30  ;;  %v1161_v27 = vor.u32 %v1160_v55, %v1159_v33 }
 0x212   : > { %v1168_v22 = vshll.u32 %v2843_v6, %v1153_v43  ;;  %v1169_v18 = vshrl.u32 %v2844_v13, %v1154_v45  ;;  %v1722_v51 = vshll.u32 %v1721_v15, 30  ;;  %v3995_v25 = vshll.u32 %v1147_v48, 8 }
 0x213   : > { %v912_v61 = vsel %vm829_vm13, %v911_v42, %v910_v32  ;;  %v1167_v26 = vor.u32 %v1166_v63, %v1165_v35  ;;  %v1164_v59 = vor.u32 %v1163_v49, %v1162_v36  ;;  %v1974_v50 = vand.u32 2139095040, %v3970_v1 }
 0x214   : > { %v915_v5 = vsel %vm3910_vm15, %v3718_v19, %v912_v61  ;;  %v1170_v7 = vor.u32 %v1169_v18, %v1168_v22  ;;  %v4001_v8 = vsub.s32 %v1719_v24, %v1722_v51  ;;  %v1745_v17 = vsub.s32 4, %v1721_v15 }
 0x215   : > { %2725 = vcosq.f32 %v915_v5  ;;  %vm1171_vm12 = vcmp.lt.s32.totalorder %v1152_v23, 1  ;;  %v1155_v43 = vshrl.u32 %v2839_v60, %v1154_v45  ;;  %vm1174_vm13 = vcmp.lt.s32.totalorder %v1152_v23, 4 }
 0x216   : > { %2727 = vsinq.f32 %v915_v5  ;;  %v1179_v39 = vsel %vm1171_vm12, %v1158_v54, %v1161_v27  ;;  %v1725_v10 = vsub.s32 0, %v4001_v8  ;;  %vm1172_vm0 = vcmp.lt.s32.totalorder %v1152_v23, 2 }
 0x217   : > { %vm1173_vm1 = vcmp.lt.s32.totalorder %v1152_v23, 3  ;;  %v1180_v44 = vsel %vm1174_vm13, %v1167_v26, 920167782  ;;  %v1176_v47 = vsel %vm1174_vm13, %v1164_v59, 2102212464  ;;  %v1183_v21 = vsel %vm1171_vm12, %v1161_v27, %v1164_v59 }
 0x218   : > { %v1181_v16 = vsel %vm1173_vm1, %v1164_v59, %v1180_v44  ;;  %v1184_v14 = vsel %vm1174_vm13, %v1170_v7, 1326507024  ;;  %v2440_v29 = vmin.u32 %v1725_v10, %v4001_v8  ;;  %v1746_v38 = vsel %vm1661_vm11, %v1745_v17, %v1721_v15 }
 0x219   : > { %v1182_v45 = vsel %vm1172_vm0, %v1179_v39, %v1181_v16  ;;  %v1185_v58 = vsel %vm1173_vm1, %v1167_v26, %v1184_v14  ;;  %v1975_v57 = vshrl.u32 %v1974_v50, 23  ;;  %v1175_v28 = vsel %vm1171_vm12, %v1155_v43, %v1158_v54 }
 0x21a   : > { %v1186_v48 = vsel %vm1172_vm0, %v1183_v21, %v1185_v58  ;;  %v4013_v37 = vmul.u32.u64.low %v3995_v25, %v1182_v45  ;;  %v4014_v3 = vmul.u32.u64.high %v3995_v25, %v1182_v45, %v4013_v37  ;;  %v1727_v24 = vclz %v2440_v29 }
 0x21b   : > { %v1177_v53 = vsel %vm1173_vm1, %v1161_v27, %v1176_v47  ;;  %vm919_vm15 = vweird.f32 %v3718_v19  ;;  %vm4020_vm4 = vcmp.le.f32.partialorder %v1659_v52, 0.7853982  ;;  %v2451_v31 = vadd.s32 4294967169, %v1975_v57 }
 0x21c   : > { %v4025_v9 = vmul.u32.u64.low %v3995_v25, %v1186_v48  ;;  %v4026_v32 = vmul.u32.u64.high %v3995_v25, %v1186_v48, %v4025_v9  ;;  %v2441_v30 = vadd.s32 4294967294, %v1727_v24  ;;  %v1748_v33 = vsel %vm4020_vm4, 0, %v1746_v38 }
 0x21d   : > { %v1971_v49 = vand.u32 2147483647, %v3970_v1  ;;  %v4033_v63 = vadd.f32 %v3966_v20, %v3593_v11  ;;  %vm922_vm2 = vcmp.lt.s32.totalorder %v3976_v12, 2  ;;  %v1178_v52 = vsel %vm1172_vm0, %v1175_v28, %v1177_v53 }
 0x21e   : > { %v1197_v42 = vadd.s32 1, %v4014_v3  ;;  %v1981_v15 = vadd.s32 1, %v2451_v31  ;;  %vm923_vm3 = vcmp.eq.s32.totalorder %v3976_v12, 0  ;;  %vm926_vm5 = vcmp.eq.s32.totalorder %v3976_v12, 2 }
 0x21f   : > { %v2726_v36 = vpop.eup %2725  ;;  %v1715_v35 = vadd.s32 %v3948_v40, %v3945_v56  ;;  %vm2442_vm6 = vcmp.lt.s32.totalorder %v2441_v30, 0  ;;  %v1752_v22 = vadd.s32 3, %v1748_v33  ;;  %vm1196_vm7 = vc.u32 %v4026_v32, %v4013_v37 }
 0x220   : > { %v2728_v54 = vpop.eup %2727  ;;  %v927_v27 = vxor.u32 2147483648, %v2726_v36  ;;  %v1730_v11 = vsel %vm2442_vm6, 0, %v2441_v30  ;;  %v1194_v51 = vmul.u32 %v3995_v25, %v1178_v52  ;;  %v1198_v59 = vsel %vm1196_vm7, %v1197_v42, %v4014_v3 }
 0x221   : > { %v924_v23 = vxor.u32 2147483648, %v2728_v54  ;;  %v1731_v18 = vsub.s32 32, %v1730_v11  ;;  %v1735_v61 = vsub.s32 4294967266, %v1730_v11  ;;  %v1732_v5 = vshll.u32 %v4001_v8, %v1730_v11 }
 0x222   : > { %v928_v26 = vsel %vm926_vm5, %v927_v27, %v2728_v54  ;;  %vm1982_vm8 = vcmp.gt.s32.totalorder %v1981_v15, 0  ;;  %v1199_v50 = vadd.s32 %v1198_v59, %v1194_v51  ;;  %v1978_v43 = vand.u32 8388607, %v1971_v49 }
 0x223   : > { %v925_v56 = vsel %vm923_vm3, %v2726_v36, %v924_v23  ;;  %v1733_v40 = vshrl.u32 %v1715_v35, %v1731_v18  ;;  %v1736_v7 = vadd.s32 127, %v1735_v61  ;;  %v1983_v25 = vsel %vm1982_vm8, %v1981_v15, 0 }
 0x224   : > { %v929_v17 = vsel %vm922_vm2, %v925_v56, %v928_v26  ;;  %v1035_v39 = vand.u32 2147483647, %v4033_v63  ;;  %v1200_v47 = vadd.s32 536870912, %v1199_v50  ;;  %v1985_v16 = vand.u32 31, %v1983_v25 }
 0x225   : > { %v930_v8 = vsel %vm919_vm15, nan, %v929_v17  ;;  %v1734_v10 = vor.u32 %v1733_v40, %v1732_v5  ;;  %v1737_v44 = vshll.u32 %v1736_v7, 23  ;;  %v4059_v12 = vand.u32 3, %v1752_v22 }
 0x226   : > { %2080 = vst.msk [vmem:[%s3243_s8 + $0x20] sm:$0xff] %vm2075_vm14, %v930_v8  ;;  %v4057_v14 = vshrl.u32 %v1200_v47, 30  ;;  %v1979_v29 = vor.u32 8388608, %v1978_v43  ;;  %v1986_v38 = vsub.s32 32, %v1985_v16  ;;  %v1038_v45 = vand.u32 2139095040, %v4033_v63 }
 0x227   : > { %v1738_v21 = vor.u32 4788187, %v1737_v44  ;;  %v1741_v48 = vcvt.s32.f32 %v1734_v10  ;;  %v4065_v3 = vand.u32 8388607, %v1035_v39  ;;  %v1195_v57 = vadd.s32 %v4013_v37, %v4026_v32 }
 0x228   : > { %v1202_v19 = vshll.u32 %v4057_v14, 30  ;;  %v1989_v24 = vshrl.u32 %v2840_v0, %v1986_v38  ;;  %v1992_v28 = vshrl.u32 %v2841_v2, %v1986_v38  ;;  %v1995_v53 = vshrl.u32 %v2842_v4, %v1986_v38 }
 0x229   : > { %v1739_v58 = vand.u32 2147483647, %v1738_v21  ;;  %v1988_v30 = vshll.u32 %v2839_v60, %v1985_v16  ;;  %v1998_v33 = vshrl.u32 %v2843_v6, %v1986_v38  ;;  %v1984_v52 = vshrl.u32 %v1983_v25, 5 }
 0x22a   : > { %v4071_v31 = vsub.s32 %v1199_v50, %v1202_v19  ;;  %v1991_v42 = vshll.u32 %v2840_v0, %v1985_v16  ;;  %v1994_v15 = vshll.u32 %v2841_v2, %v1985_v16  ;;  %v1039_v36 = vshrl.u32 %v1038_v45, 23 }
 0x22b   : > { %v1742_v9 = vmul.f32 %v1741_v48, %v1739_v58  ;;  %v1990_v35 = vor.u32 %v1989_v24, %v1988_v30  ;;  %v1997_v54 = vshll.u32 %v2842_v4, %v1985_v16  ;;  %v2000_v22 = vshll.u32 %v2843_v6, %v1985_v16 }
 0x22c   : > { %v1205_v32 = vsub.s32 0, %v4071_v31  ;;  %v1993_v27 = vor.u32 %v1992_v28, %v1991_v42  ;;  %v1996_v11 = vor.u32 %v1995_v53, %v1994_v15  ;;  %v2001_v23 = vshrl.u32 %v2844_v13, %v1986_v38 }
 0x22d   : > { %v1743_v37 = vxor.u32 2147483648, %v1742_v9  ;;  %v1999_v51 = vor.u32 %v1998_v33, %v1997_v54  ;;  %v4084_v26 = vshll.u32 %v1979_v29, 8  ;;  %v1987_v59 = vshrl.u32 %v2839_v60, %v1986_v38 }
 0x22e   : > { %v2420_v61 = vmin.u32 %v1205_v32, %v4071_v31  ;;  %v2002_v56 = vor.u32 %v2001_v23, %v2000_v22  ;;  %v2415_v40 = vadd.s32 4294967169, %v1039_v36  ;;  %vm2003_vm9 = vcmp.lt.s32.totalorder %v1984_v52, 1 }
 0x22f   : > { %v1744_v18 = vsel %vm1661_vm11, %v1743_v37, %v1742_v9  ;;  %vm2006_vm10 = vcmp.lt.s32.totalorder %v1984_v52, 4  ;;  %vm1141_vm11 = vcmp.lt.s32.totalorder %v3871_v34, 0  ;;  %vm2004_vm12 = vcmp.lt.s32.totalorder %v1984_v52, 2 }
 0x230   : > { %v1747_v5 = vsel %vm4020_vm4, %v3811_v62, %v1744_v18  ;;  %v1207_v7 = vclz %v2420_v61  ;;  %v2008_v50 = vsel %vm2006_vm10, %v1996_v11, 2102212464  ;;  %v2011_v17 = vsel %vm2003_vm9, %v1990_v35, %v1993_v27 }
 0x231   : > { %2729 = vcosq.f32 %v1747_v5  ;;  %vm2005_vm13 = vcmp.lt.s32.totalorder %v1984_v52, 3  ;;  %v2012_v25 = vsel %vm2006_vm10, %v1999_v51, 920167782  ;;  %v2015_v8 = vsel %vm2003_vm9, %v1993_v27, %v1996_v11 }
 0x232   : > { %2731 = vsinq.f32 %v1747_v5  ;;  %v2421_v43 = vadd.s32 4294967294, %v1207_v7  ;;  %v2007_v55 = vsel %vm2003_vm9, %v1987_v59, %v1990_v35  ;;  %v2013_v10 = vsel %vm2005_vm13, %v1996_v11, %v2012_v25 }
 0x233   : > { %v2016_v44 = vsel %vm2006_vm10, %v2002_v56, 1326507024  ;;  %v1045_v47 = vadd.s32 1, %v2415_v40  ;;  %v2009_v16 = vsel %vm2005_vm13, %v1993_v27, %v2008_v50  ;;  %v2014_v21 = vsel %vm2004_vm12, %v2011_v17, %v2013_v10 }
 0x234   : > { %vm2422_vm0 = vcmp.lt.s32.totalorder %v2421_v43, 0  ;;  %v2017_v29 = vsel %vm2005_vm13, %v1999_v51, %v2016_v44  ;;  %v4094_v58 = vmul.u32.u64.low %v4084_v26, %v2014_v21  ;;  %v4095_v48 = vmul.u32.u64.high %v4084_v26, %v2014_v21, %v4094_v58 }
 0x235   : > { %v1210_v38 = vsel %vm2422_vm0, 0, %v2421_v43  ;;  %v2018_v45 = vsel %vm2004_vm12, %v2015_v8, %v2017_v29  ;;  %v1225_v28 = vsub.s32 4, %v4057_v14  ;;  %vm1046_vm1 = vcmp.gt.s32.totalorder %v1045_v47, 0 }
 0x236   : > { %v1211_v19 = vsub.s32 32, %v1210_v38  ;;  %v1215_v24 = vsub.s32 4294967266, %v1210_v38  ;;  %vm1751_vm15 = vweird.f32 %v3811_v62  ;;  %v2010_v53 = vsel %vm2004_vm12, %v2007_v55, %v2009_v16 }
 0x237   : > { %v4102_v9 = vmul.u32.u64.low %v4084_v26, %v2018_v45  ;;  %v4103_v30 = vmul.u32.u64.high %v4084_v26, %v2018_v45, %v4102_v9  ;;  %v1047_v33 = vsel %vm1046_vm1, %v1045_v47, 0  ;;  %v1212_v42 = vshll.u32 %v4071_v31, %v1210_v38 }
 0x238   : > { %v1213_v15 = vshrl.u32 %v1195_v57, %v1211_v19  ;;  %v1216_v36 = vadd.s32 127, %v1215_v24  ;;  %v1049_v37 = vand.u32 31, %v1047_v33  ;;  %vm1754_vm4 = vcmp.lt.s32.totalorder %v4059_v12, 2 }
 0x239   : > { %vm1755_vm2 = vcmp.eq.s32.totalorder %v4059_v12, 0  ;;  %vm4110_vm3 = vcmp.le.f32.partialorder %v1139_v46, 0.7853982  ;;  %v2029_v52 = vadd.s32 1, %v4095_v48  ;;  %vm1758_vm5 = vcmp.eq.s32.totalorder %v4059_v12, 2 }
 0x23a   : > { %v1214_v54 = vor.u32 %v1213_v15, %v1212_v42  ;;  %v1217_v31 = vshll.u32 %v1216_v36, 23  ;;  %v1226_v57 = vsel %vm1141_vm11, %v1225_v28, %v4057_v14  ;;  %v2026_v22 = vmul.u32 %v4084_v26, %v2010_v53 }
 0x23b   : > { %v2730_v35 = vpop.eup %2729  ;;  %vm2028_vm6 = vc.u32 %v4103_v30, %v4094_v58  ;;  %v1050_v46 = vsub.s32 32, %v1049_v37  ;;  %v1043_v51 = vor.u32 8388608, %v4065_v3  ;;  %v1228_v59 = vsel %vm4110_vm3, 0, %v1226_v57 }
 0x23c   : > { %v2732_v27 = vpop.eup %2731  ;;  %v1759_v11 = vxor.u32 2147483648, %v2730_v35  ;;  %v1218_v18 = vor.u32 4788187, %v1217_v31  ;;  %v2030_v61 = vsel %vm2028_vm6, %v2029_v52, %v4095_v48  ;;  %v4128_v56 = vadd.f32 %v3966_v20, %v3676_v41 }
 0x23d   : > { %v1756_v23 = vxor.u32 2147483648, %v2732_v27  ;;  %v2031_v14 = vadd.s32 %v2030_v61, %v2026_v22  ;;  %v1221_v7 = vcvt.s32.f32 %v1214_v54  ;;  %v1048_v50 = vshrl.u32 %v1047_v33, 5 }
 0x23e   : > { %v1760_v5 = vsel %vm1758_vm5, %v1759_v11, %v2732_v27  ;;  %v1219_v40 = vand.u32 2147483647, %v1218_v18  ;;  %v1053_v43 = vshrl.u32 %v2840_v0, %v1050_v46  ;;  %v1056_v25 = vshrl.u32 %v2841_v2, %v1050_v46 }
 0x23f   : > { %v1757_v26 = vsel %vm1755_vm2, %v2730_v35, %v1756_v23  ;;  %v2032_v3 = vadd.s32 536870912, %v2031_v14  ;;  %v1052_v41 = vshll.u32 %v2839_v60, %v1049_v37  ;;  %v1059_v20 = vshrl.u32 %v2842_v4, %v1050_v46 }
 0x240   : > { %v1761_v17 = vsel %vm1754_vm4, %v1757_v26, %v1760_v5  ;;  %v1222_v55 = vmul.f32 %v1221_v7, %v1219_v40  ;;  %v1055_v12 = vshll.u32 %v2840_v0, %v1049_v37  ;;  %v1058_v44 = vshll.u32 %v2841_v2, %v1049_v37 }
 0x241   : > { %v1762_v8 = vsel %vm1751_vm15, nan, %v1761_v17  ;;  %v4142_v10 = vshrl.u32 %v2032_v3, 30  ;;  %v1062_v47 = vshrl.u32 %v2843_v6, %v1050_v46  ;;  %v1061_v21 = vshll.u32 %v2842_v4, %v1049_v37 }
 0x242   : > { %2088 = vst.msk [vmem:[%s3243_s8 + $0x60] sm:$0xff] %vm2075_vm14, %v1762_v8  ;;  %v1223_v16 = vxor.u32 2147483648, %v1222_v55  ;;  %v1064_v62 = vshll.u32 %v2843_v6, %v1049_v37  ;;  %v1065_v29 = vshrl.u32 %v2844_v13, %v1050_v46  ;;  %v1054_v45 = vor.u32 %v1053_v43, %v1052_v41 }
 0x243   : > { %v2034_v38 = vshll.u32 %v4142_v10, 30  ;;  %v1057_v48 = vor.u32 %v1056_v25, %v1055_v12  ;;  %v4151_v19 = vshll.u32 %v1043_v51, 8  ;;  %v1060_v28 = vor.u32 %v1059_v20, %v1058_v44 }
 0x244   : > { %v1224_v24 = vsel %vm1141_vm11, %v1223_v16, %v1222_v55  ;;  %v1063_v53 = vor.u32 %v1062_v47, %v1061_v21  ;;  %v1066_v9 = vor.u32 %v1065_v29, %v1064_v62  ;;  %v1232_v42 = vadd.s32 3, %v1228_v59 }
 0x245   : > { %v1227_v33 = vsel %vm4110_vm3, %v3871_v34, %v1224_v24  ;;  %v2035_v15 = vsub.s32 %v2031_v14, %v2034_v38  ;;  %v1870_v36 = vand.u32 2139095040, %v4128_v56  ;;  %v1051_v37 = vshrl.u32 %v2839_v60, %v1050_v46 }
 0x246   : > { %2733 = vcosq.f32 %v1227_v33  ;;  %vm1067_vm7 = vcmp.lt.s32.totalorder %v1048_v50, 1  ;;  %vm1069_vm8 = vcmp.lt.s32.totalorder %v1048_v50, 3  ;;  %vm1070_vm9 = vcmp.lt.s32.totalorder %v1048_v50, 4 }
 0x247   : > { %2735 = vsinq.f32 %v1227_v33  ;;  %v2037_v52 = vsub.s32 0, %v2035_v15  ;;  %v1075_v35 = vsel %vm1067_vm7, %v1054_v45, %v1057_v48  ;;  %v1072_v54 = vsel %vm1070_vm9, %v1060_v28, 2102212464 }
 0x248   : > { %v1076_v31 = vsel %vm1070_vm9, %v1063_v53, 920167782  ;;  %v1079_v57 = vsel %vm1067_vm7, %v1057_v48, %v1060_v28  ;;  %v1080_v32 = vsel %vm1070_vm9, %v1066_v9, 1326507024  ;;  %vm1068_vm10 = vcmp.lt.s32.totalorder %v1048_v50, 2 }
 0x249   : > { %v2452_v27 = vmin.u32 %v2037_v52, %v2035_v15  ;;  %v1077_v11 = vsel %vm1069_vm8, %v1060_v28, %v1076_v31  ;;  %v1081_v22 = vsel %vm1069_vm8, %v1063_v53, %v1080_v32  ;;  %v1233_v23 = vand.u32 3, %v1232_v42 }
 0x24a   : > { %v1078_v46 = vsel %vm1068_vm10, %v1075_v35, %v1077_v11  ;;  %v1082_v18 = vsel %vm1068_vm10, %v1079_v57, %v1081_v22  ;;  %v1871_v61 = vshrl.u32 %v1870_v36, 23  ;;  %v1071_v5 = vsel %vm1067_vm7, %v1051_v37, %v1054_v45 }
 0x24b   : > { %v2039_v51 = vclz %v2452_v27  ;;  %v1073_v59 = vsel %vm1069_vm8, %v1057_v48, %v1072_v54  ;;  %v4169_v14 = vmul.u32.u64.low %v4151_v19, %v1082_v18  ;;  %v4170_v26 = vmul.u32.u64.high %v4151_v19, %v1082_v18, %v4169_v14 }
 0x24c   : > { %v4173_v40 = vmul.u32.u64.low %v4151_v19, %v1078_v46  ;;  %v4174_v7 = vmul.u32.u64.high %v4151_v19, %v1078_v46, %v4173_v40  ;;  %v2447_v3 = vadd.s32 4294967169, %v1871_v61  ;;  %vm1231_vm11 = vweird.f32 %v3871_v34 }
 0x24d   : > { %v2453_v17 = vadd.s32 4294967294, %v2039_v51  ;;  %vm1235_vm12 = vcmp.eq.s32.totalorder %v1233_v23, 0  ;;  %v1074_v43 = vsel %vm1068_vm10, %v1071_v5, %v1073_v59  ;;  %vm1238_vm13 = vcmp.eq.s32.totalorder %v1233_v23, 2 }
 0x24e   : > { %v2027_v25 = vadd.s32 %v4094_v58, %v4103_v30  ;;  %v1877_v8 = vadd.s32 1, %v2447_v3  ;;  %v2057_v20 = vsub.s32 4, %v4142_v10  ;;  %vm1092_vm1 = vc.u32 %v4170_v26, %v4173_v40 }
 0x24f   : > { %vm2454_vm0 = vcmp.lt.s32.totalorder %v2453_v17, 0  ;;  %v1093_v12 = vadd.s32 1, %v4174_v7  ;;  %v1090_v21 = vmul.u32 %v4151_v19, %v1074_v43  ;;  %vm1234_vm4 = vcmp.lt.s32.totalorder %v1233_v23, 2 }
 0x250   : > { %v2734_v55 = vpop.eup %2733  ;;  %v2042_v41 = vsel %vm2454_vm0, 0, %v2453_v17  ;;  %vm1878_vm15 = vcmp.gt.s32.totalorder %v1877_v8, 0  ;;  %v1867_v28 = vand.u32 2147483647, %v4128_v56  ;;  %vm1973_vm2 = vcmp.lt.s32.totalorder %v3970_v1, 0 }
 0x251   : > { %v2736_v44 = vpop.eup %2735  ;;  %v1239_v47 = vxor.u32 2147483648, %v2734_v55  ;;  %v2043_v16 = vsub.s32 32, %v2042_v41  ;;  %v2047_v50 = vsub.s32 4294967266, %v2042_v41  ;;  %v2044_v29 = vshll.u32 %v2035_v15, %v2042_v41 }
 0x252   : > { %v1236_v62 = vxor.u32 2147483648, %v2736_v44  ;;  %v1094_v58 = vsel %vm1092_vm1, %v1093_v12, %v4174_v7  ;;  %v1879_v53 = vsel %vm1878_vm15, %v1877_v8, 0  ;;  %v2058_v52 = vsel %vm1973_vm2, %v2057_v20, %v4142_v10 }
 0x253   : > { %v1240_v30 = vsel %vm1238_vm13, %v1239_v47, %v2736_v44  ;;  %v2045_v38 = vshrl.u32 %v2027_v25, %v2043_v16  ;;  %v2048_v45 = vadd.s32 127, %v2047_v50  ;;  %v1095_v48 = vadd.s32 %v1094_v58, %v1090_v21 }
 0x254   : > { %v1237_v24 = vsel %vm1235_vm12, %v2734_v55, %v1236_v62  ;;  %v1881_v36 = vand.u32 31, %v1879_v53  ;;  %v1874_v54 = vand.u32 8388607, %v1867_v28  ;;  %vm4204_vm3 = vcmp.le.f32.partialorder %v1971_v49, 0.7853982 }
 0x255   : > { %v1241_v9 = vsel %vm1234_vm4, %v1237_v24, %v1240_v30  ;;  %v2046_v33 = vor.u32 %v2045_v38, %v2044_v29  ;;  %v2049_v19 = vshll.u32 %v2048_v45, 23  ;;  %v1096_v42 = vadd.s32 536870912, %v1095_v48 }
 0x256   : > { %v1242_v15 = vsel %vm1231_vm11, nan, %v1241_v9  ;;  %v1882_v31 = vsub.s32 32, %v1881_v36  ;;  %v2060_v11 = vsel %vm4204_vm3, 0, %v2058_v52  ;;  %v1884_v49 = vshll.u32 %v2839_v60, %v1881_v36 }
 0x257   : > { %2083 = vst.msk [vmem:[%s3243_s8 + $0x38] sm:$0xff] %vm2075_vm14, %v1242_v15  ;;  %v2050_v37 = vor.u32 4788187, %v2049_v19  ;;  %v4198_v35 = vshrl.u32 %v1096_v42, 30  ;;  %v2053_v32 = vcvt.s32.f32 %v2046_v33  ;;  %v1875_v51 = vor.u32 8388608, %v1874_v54 }
 0x258   : > { %v1885_v10 = vshrl.u32 %v2840_v0, %v1882_v31  ;;  %v1888_v22 = vshrl.u32 %v2841_v2, %v1882_v31  ;;  %v1891_v23 = vshrl.u32 %v2842_v4, %v1882_v31  ;;  %v1894_v61 = vshrl.u32 %v2843_v6, %v1882_v31 }
 0x259   : > { %v2051_v57 = vand.u32 2147483647, %v2050_v37  ;;  %v1098_v27 = vshll.u32 %v4198_v35, 30  ;;  %v1880_v5 = vshrl.u32 %v1879_v53, 5  ;;  %v1887_v59 = vshll.u32 %v2840_v0, %v1881_v36 }
 0x25a   : > { %v1890_v14 = vshll.u32 %v2841_v2, %v1881_v36  ;;  %v1886_v3 = vor.u32 %v1885_v10, %v1884_v49  ;;  %v1893_v43 = vshll.u32 %v2842_v4, %v1881_v36  ;;  %v1896_v55 = vshll.u32 %v2843_v6, %v1881_v36 }
 0x25b   : > { %v2054_v46 = vmul.f32 %v2053_v32, %v2051_v57  ;;  %v1099_v18 = vsub.s32 %v1095_v48, %v1098_v27  ;;  %v1889_v25 = vor.u32 %v1888_v22, %v1887_v59  ;;  %v1897_v41 = vshrl.u32 %v2844_v13, %v1882_v31 }
 0x25c   : > { %v1892_v8 = vor.u32 %v1891_v23, %v1890_v14  ;;  %v1895_v44 = vor.u32 %v1894_v61, %v1893_v43  ;;  %v2064_v2 = vadd.s32 3, %v2060_v11  ;;  %v1915_v16 = vshll.u32 %v1875_v51, 8 }
 0x25d   : > { %v2055_v7 = vxor.u32 2147483648, %v2054_v46  ;;  %v1101_v17 = vsub.s32 0, %v1099_v18  ;;  %v1898_v47 = vor.u32 %v1897_v41, %v1896_v55  ;;  %vm1899_vm5 = vcmp.lt.s32.totalorder %v1880_v5, 1 }
 0x25e   : > { %vm1902_vm6 = vcmp.lt.s32.totalorder %v1880_v5, 4  ;;  %v1883_v6 = vshrl.u32 %v2839_v60, %v1882_v31  ;;  %v1907_v50 = vsel %vm1899_vm5, %v1886_v3, %v1889_v25  ;;  %vm1901_vm7 = vcmp.lt.s32.totalorder %v1880_v5, 3 }
 0x25f   : > { %v2056_v20 = vsel %vm1973_vm2, %v2055_v7, %v2054_v46  ;;  %v2416_v12 = vmin.u32 %v1101_v17, %v1099_v18  ;;  %v1904_v13 = vsel %vm1902_vm6, %v1892_v8, 2102212464  ;;  %v1908_v62 = vsel %vm1902_vm6, %v1895_v44, 920167782 }
 0x260   : > { %v2059_v0 = vsel %vm4204_vm3, %v3970_v1, %v2056_v20  ;;  %v1911_v29 = vsel %vm1899_vm5, %v1889_v25, %v1892_v8  ;;  %vm1900_vm8 = vcmp.lt.s32.totalorder %v1880_v5, 2  ;;  %v1903_v58 = vsel %vm1899_vm5, %v1883_v6, %v1886_v3 }
 0x261   : > { %2737 = vcosq.f32 %v2059_v0  ;;  %v1103_v4 = vclz %v2416_v12  ;;  %v1909_v30 = vsel %vm1901_vm7, %v1892_v8, %v1908_v62  ;;  %v1912_v38 = vsel %vm1902_vm6, %v1898_v47, 1326507024 }
 0x262   : > { %2739 = vsinq.f32 %v2059_v0  ;;  %v1905_v45 = vsel %vm1901_vm7, %v1889_v25, %v1904_v13  ;;  %v1910_v48 = vsel %vm1900_vm8, %v1907_v50, %v1909_v30  ;;  %v1913_v24 = vsel %vm1901_vm7, %v1895_v44, %v1912_v38 }
 0x263   : > { %v2417_v21 = vadd.s32 4294967294, %v1103_v4  ;;  %v1914_v9 = vsel %vm1900_vm8, %v1911_v29, %v1913_v24  ;;  %v4229_v33 = vmul.u32.u64.low %v1915_v16, %v1910_v48  ;;  %v4230_v60 = vmul.u32.u64.high %v1915_v16, %v1910_v48, %v4229_v33 }
 0x264   : > { %v1091_v19 = vadd.s32 %v4173_v40, %v4170_v26  ;;  %v2065_v36 = vand.u32 3, %v2064_v2  ;;  %v4234_v37 = vmul.u32.u64.low %v1915_v16, %v1914_v9  ;;  %v4235_v52 = vmul.u32.u64.high %v1915_v16, %v1914_v9, %v4234_v37 }
 0x265   : > { %vm2418_vm9 = vcmp.lt.s32.totalorder %v2417_v21, 0  ;;  %v1906_v57 = vsel %vm1900_vm8, %v1903_v58, %v1905_v45  ;;  %v1925_v32 = vadd.s32 1, %v4230_v60  ;;  %vm2063_vm0 = vweird.f32 %v3970_v1 }
 0x266   : > { %v1106_v53 = vsel %vm2418_vm9, 0, %v2417_v21  ;;  %v1922_v46 = vmul.u32 %v1915_v16, %v1906_v57  ;;  %vm1924_vm10 = vc.u32 %v4235_v52, %v4229_v33  ;;  %vm2070_vm11 = vcmp.eq.s32.totalorder %v2065_v36, 2 }
 0x267   : > { %v1107_v42 = vsub.s32 32, %v1106_v53  ;;  %v1111_v15 = vsub.s32 4294967266, %v1106_v53  ;;  %v1108_v54 = vshll.u32 %v1099_v18, %v1106_v53  ;;  %v1926_v18 = vsel %vm1924_vm10, %v1925_v32, %v4230_v60 }
 0x268   : > { %vm2067_vm12 = vcmp.eq.s32.totalorder %v2065_v36, 0  ;;  %v1927_v61 = vadd.s32 %v1926_v18, %v1922_v46  ;;  %vm2066_vm13 = vcmp.lt.s32.totalorder %v2065_v36, 2  ;;  %v1121_v43 = vsub.s32 4, %v4198_v35 }
 0x269   : > { %v1109_v31 = vshrl.u32 %v1091_v19, %v1107_v42  ;;  %v1112_v34 = vadd.s32 127, %v1111_v15  ;;  %vm1037_vm1 = vcmp.lt.s32.totalorder %v4033_v63, 0  ;;  %vm1036_vm15 = vcmp.le.f32.partialorder %v1035_v39, 0.7853982 }
 0x26a   : > { %v1928_v7 = vadd.s32 536870912, %v1927_v61  ;;  %v1122_v20 = vsel %vm1037_vm1, %v1121_v43, %v4198_v35  ;;  %v1923_v62 = vadd.s32 %v4229_v33, %v4235_v52  ;;  %vm1127_vm6 = vweird.f32 %v4033_v63 }
 0x26b   : > { %v2738_v27 = vpop.eup %2737  ;;  %v1110_v11 = vor.u32 %v1109_v31, %v1108_v54  ;;  %v1113_v10 = vshll.u32 %v1112_v34, 23  ;;  %v1124_v44 = vsel %vm1036_vm15, 0, %v1122_v20  ;;  %vm1869_vm7 = vcmp.lt.s32.totalorder %v4128_v56, 0 }
 0x26c   : > { %v2740_v22 = vpop.eup %2739  ;;  %v2071_v23 = vxor.u32 2147483648, %v2738_v27  ;;  %v1929_v25 = vshrl.u32 %v1928_v7, 30  ;;  %v1128_v47 = vadd.s32 3, %v1124_v44  ;;  %vm1868_vm8 = vcmp.le.f32.partialorder %v1867_v28, 0.7853982 }
 0x26d   : > { %v2068_v26 = vxor.u32 2147483648, %v2740_v22  ;;  %v1114_v40 = vor.u32 4788187, %v1113_v10  ;;  %v1117_v59 = vcvt.s32.f32 %v1110_v11 }
 0x26e   : > { %v2072_v49 = vsel %vm2070_vm11, %v2071_v23, %v2740_v22  ;;  %v1930_v55 = vshll.u32 %v1929_v25, 30  ;;  %v1129_v6 = vand.u32 3, %v1128_v47  ;;  %v1953_v37 = vsub.s32 4, %v1929_v25 }
 0x26f   : > { %v2069_v51 = vsel %vm2067_vm12, %v2738_v27, %v2068_v26  ;;  %v1115_v5 = vand.u32 2147483647, %v1114_v40  ;;  %vm1959_vm12 = vweird.f32 %v4128_v56 }
 0x270   : > { %v2073_v14 = vsel %vm2066_vm13, %v2069_v51, %v2072_v49  ;;  %v1931_v12 = vsub.s32 %v1927_v61, %v1930_v55  ;;  %vm1131_vm2 = vcmp.eq.s32.totalorder %v1129_v6, 0  ;;  %vm1134_vm3 = vcmp.eq.s32.totalorder %v1129_v6, 2 }
 0x271   : > { %v2074_v17 = vsel %vm2063_vm0, nan, %v2073_v14  ;;  %v1118_v3 = vmul.f32 %v1117_v59, %v1115_v5  ;;  %vm1130_vm5 = vcmp.lt.s32.totalorder %v1129_v6, 2  ;;  %v1954_v31 = vsel %vm1869_vm7, %v1953_v37, %v1929_v25 }
 0x272   : > { %2091 = vst.msk [vmem:[%s3243_s8 + $0x78] sm:$0xff] %vm2075_vm14, %v2074_v17  ;;  %v1933_v0 = vsub.s32 0, %v1931_v12  ;;  %v1956_v34 = vsel %vm1868_vm8, 0, %v1954_v31 }
 0x273   : > { %v1119_v8 = vxor.u32 2147483648, %v1118_v3  ;;  %v1960_v57 = vadd.s32 3, %v1956_v34 }
 0x274   : > { %v2448_v2 = vmin.u32 %v1933_v0, %v1931_v12 }
 0x275   : > { %v1120_v41 = vsel %vm1037_vm1, %v1119_v8, %v1118_v3  ;;  %v1961_v32 = vand.u32 3, %v1960_v57 }
 0x276   : > { %v1123_v1 = vsel %vm1036_vm15, %v4033_v63, %v1120_v41  ;;  %v1935_v16 = vclz %v2448_v2 }
 0x277   : > { %2741 = vcosq.f32 %v1123_v1  ;;  %vm1966_vm9 = vcmp.eq.s32.totalorder %v1961_v32, 2  ;;  %vm1963_vm10 = vcmp.eq.s32.totalorder %v1961_v32, 0  ;;  %vm1962_vm11 = vcmp.lt.s32.totalorder %v1961_v32, 2 }
 0x278   : > { %2743 = vsinq.f32 %v1123_v1  ;;  %v2449_v4 = vadd.s32 4294967294, %v1935_v16 }
 0x27a   : > { %vm2450_vm4 = vcmp.lt.s32.totalorder %v2449_v4, 0 }
 0x27b   : > { %v1938_v50 = vsel %vm2450_vm4, 0, %v2449_v4 }
 0x27c   : > { %v1939_v35 = vsub.s32 32, %v1938_v50  ;;  %v1943_v29 = vsub.s32 4294967266, %v1938_v50  ;;  %v1940_v38 = vshll.u32 %v1931_v12, %v1938_v50 }
 0x27e   : > { %v1941_v45 = vshrl.u32 %v1923_v62, %v1939_v35  ;;  %v1944_v48 = vadd.s32 127, %v1943_v29 }
 0x280   : > { %v1942_v9 = vor.u32 %v1941_v45, %v1940_v38  ;;  %v1945_v60 = vshll.u32 %v1944_v48, 23 }
 0x281   : > { %v2742_v13 = vpop.eup %2741 }
 0x282   : > { %v2744_v21 = vpop.eup %2743  ;;  %v1135_v39 = vxor.u32 2147483648, %v2742_v13  ;;  %v1946_v33 = vor.u32 4788187, %v1945_v60  ;;  %v1949_v15 = vcvt.s32.f32 %v1942_v9 }
 0x283   : > { %v1132_v58 = vxor.u32 2147483648, %v2744_v21 }
 0x284   : > { %v1136_v30 = vsel %vm1134_vm3, %v1135_v39, %v2744_v21  ;;  %v1947_v42 = vand.u32 2147483647, %v1946_v33 }
 0x285   : > { %v1133_v24 = vsel %vm1131_vm2, %v2742_v13, %v1132_v58 }
 0x286   : > { %v1137_v53 = vsel %vm1130_vm5, %v1133_v24, %v1136_v30  ;;  %v1950_v36 = vmul.f32 %v1949_v15, %v1947_v42 }
 0x287   : > { %v1138_v19 = vsel %vm1127_vm6, nan, %v1137_v53 }
 0x288   : > { %2082 = vst.msk [vmem:[%s3243_s8 + $0x30] sm:$0xff] %vm2075_vm14, %v1138_v19  ;;  %v1951_v52 = vxor.u32 2147483648, %v1950_v36 }
 0x28a   : > { %v1952_v54 = vsel %vm1869_vm7, %v1951_v52, %v1950_v36 }
 0x28b   : > { %v1955_v63 = vsel %vm1868_vm8, %v4128_v56, %v1952_v54 }
 0x28c   : > { %2745 = vcosq.f32 %v1955_v63 }
 0x28d   : > { %2747 = vsinq.f32 %v1955_v63 }
 0x296   : > { %v2746_v27 = vpop.eup %2745 }
 0x297   : > { %v2748_v11 = vpop.eup %2747  ;;  %v1967_v10 = vxor.u32 2147483648, %v2746_v27  ;;  %2098 = sbr.rel (!%p2890_p4) target bundleno = 719 (0x2cf), region = 36 }
 0x298   : > { %v1964_v22 = vxor.u32 2147483648, %v2748_v11 }
 0x299   : > { %v1968_v23 = vsel %vm1966_vm9, %v1967_v10, %v2748_v11 }
 0x29a   : > { %v1965_v46 = vsel %vm1963_vm10, %v2746_v27, %v1964_v22 }
 0x29b   : > { %v1969_v28 = vsel %vm1962_vm11, %v1965_v46, %v1968_v23 }
 0x29c   : > { %v1970_v26 = vsel %vm1959_vm12, nan, %v1969_v28 }
 0x29d   : > { %2090 = vst.msk [vmem:[%s3243_s8 + $0x70] sm:$0xff] %vm2075_vm14, %v1970_v26 }
 0x29e   : > { %s4401_s14 = smov (!%p2101_p8, %s2100_s14), 16 }
 0x29f   : > { %s2457_s23 = sshll.u32 %s4401_s14, 7 }
 0x2a0   : > { %p2460_p9 = scmp.eq.s32.totalorder %s2457_s23, 0 }
 0x2a1   : > { %s4274_s24 = sshrl.u32 (!%p2460_p9), %s4401_s14, 4 }
 0x2a2   : > { %2109 = sbr.rel (%p2460_p9) target bundleno = 719 (0x2cf), region = 40  ;;  %p2461_p10 = scmp.le.s32.totalorder (!%p2460_p9), %s4274_s24, 0 }
 0x2a9   : > { %2323 = sbr.rel (%p2461_p10) target bundleno = 698 (0x2ba), region = 116  ;;  %s4394_s15 = smov (!%p2461_p10), %s4268_s22 }
 0x2aa   : > { %s4395_s20 = smov (!%p2461_p10), %s3243_s8  ;;  %s4283_s25 = smov (!%p2461_p10), 0  }
 0x2ab   : > { %s4285_s26 = smov (!%p2461_p10), 0  }
 0x2b0 LB: >> { %v2201_v56 = vld [vmem:[%s2813_s20] sm:$0xff]  ;;  %v2203_v40 = vld [vmem:[%s2813_s20 + $0x8] sm:$0xff]  ;;  %v2205_v18 = vld [vmem:[%s2813_s20 + $0x10] sm:$0xff]  ;;  %s2233_s27 = sadd.s32 1, %s2817_s25  ;;  %s2195_s26 = sadd.s32 1, %s2821_s26   ;;  %s2821_s26 = sphi %s4285_s26, %s2195_s26   ;;  %s2817_s25 = sphi %s4283_s25, %s4396_s25   ;;  %s2813_s20 = sphi %s4395_s20, %s2238_s20   ;;  %s2809_s15 = sphi %s4394_s15, %s2239_s15  }
 0x2b1   : >> { %2202 = vst [vmem:[%s2809_s15] sm:$0xff] %v2201_v56  ;;  %2204 = vst [vmem:[%s2809_s15 + $0x8] sm:$0xff] %v2203_v40  ;;  %v2207_v49 = vld [vmem:[%s2813_s20 + $0x18] sm:$0xff]  ;;  %v2209_v61 = vld [vmem:[%s2813_s20 + $0x20] sm:$0xff]  ;;  %p2234_p11 = scmp.ge.s32.totalorder %s2233_s27, %s4274_s24  ;;  %p2194_p12 = scmp.ge.s32.totalorder %s2195_s26, %s4274_s24 }
 0x2b2   : >> { %2206 = vst [vmem:[%s2809_s15 + $0x10] sm:$0xff] %v2205_v18  ;;  %v2211_v51 = vld [vmem:[%s2813_s20 + $0x28] sm:$0xff]  ;;  %2208 = vst [vmem:[%s2809_s15 + $0x18] sm:$0xff] %v2207_v49  ;;  %v2213_v5 = vld [vmem:[%s2813_s20 + $0x30] sm:$0xff] }
 0x2b3   : >> { %2210 = vst [vmem:[%s2809_s15 + $0x20] sm:$0xff] %v2209_v61  ;;  %2212 = vst [vmem:[%s2809_s15 + $0x28] sm:$0xff] %v2211_v51  ;;  %v2215_v59 = vld [vmem:[%s2813_s20 + $0x38] sm:$0xff]  ;;  %v2217_v14 = vld [vmem:[%s2813_s20 + $0x40] sm:$0xff]  ;;  %s4403_s27 = smov (%p2234_p11, %s2233_s27), 0  ;;  %2197 = sbr.rel (!%p2194_p12) target bundleno = 688 (0x2b0), region = 122 }
 0x2b4   : >> { %2214 = vst [vmem:[%s2809_s15 + $0x30] sm:$0xff] %v2213_v5  ;;  %2216 = vst [vmem:[%s2809_s15 + $0x38] sm:$0xff] %v2215_v59  ;;  %v2219_v7 = vld [vmem:[%s2813_s20 + $0x48] sm:$0xff]  ;;  %v2221_v17 = vld [vmem:[%s2813_s20 + $0x50] sm:$0xff]  ;;  %s2462_s28 = sshll.u32 %s4403_s27, 7  ;;  %s4396_s25 = smov %s4403_s27 }
 0x2b5   : >> { %2218 = vst [vmem:[%s2809_s15 + $0x40] sm:$0xff] %v2217_v14  ;;  %v2223_v3 = vld [vmem:[%s2813_s20 + $0x58] sm:$0xff]  ;;  %2220 = vst [vmem:[%s2809_s15 + $0x48] sm:$0xff] %v2219_v7  ;;  %v2225_v43 = vld [vmem:[%s2813_s20 + $0x60] sm:$0xff] }
 0x2b6   : >> { %2222 = vst [vmem:[%s2809_s15 + $0x50] sm:$0xff] %v2221_v17  ;;  %2224 = vst [vmem:[%s2809_s15 + $0x58] sm:$0xff] %v2223_v3  ;;  %v2227_v25 = vld [vmem:[%s2813_s20 + $0x68] sm:$0xff]  ;;  %v2229_v8 = vld [vmem:[%s2813_s20 + $0x70] sm:$0xff] }
 0x2b7   : >> { %2226 = vst [vmem:[%s2809_s15 + $0x60] sm:$0xff] %v2225_v43  ;;  %2228 = vst [vmem:[%s2809_s15 + $0x68] sm:$0xff] %v2227_v25  ;;  %v2231_v55 = vld [vmem:[%s2813_s20 + $0x78] sm:$0xff]  ;;  %s2238_s20 = scalar_lea.vmem %s3243_s8, %s2462_s28 [#allocation2]  }
 0x2b8   : >> { %2230 = vst [vmem:[%s2809_s15 + $0x70] sm:$0xff] %v2229_v8  ;;  %2232 = vst [vmem:[%s2809_s15 + $0x78] sm:$0xff] %v2231_v55  ;;  %s2239_s15 = scalar_lea.vmem %s4268_s22, %s2462_s28  }
 0x2ba PF: > { %s4343_s29 = sand.u32 15, %s4401_s14   ;;  %s2473_s30 = sshll.u32 %s4274_s24, 7 }
 0x2bb   : > { %s2244_s4 = scalar_lea.vmem %s3243_s8, %s2473_s30 [#allocation2]   ;;  %s2246_s5 = scalar_lea.vmem %s4268_s22, %s2473_s30  }
 0x2bc   : > { %p2467_p13 = scmp.le.s32.totalorder %s4343_s29, 0 }
 0x2bd   : > { %s2823_s6 = smov (!%p2467_p13), %s2246_s5   ;;  %s2827_s7 = smov (!%p2467_p13), %s2244_s4  }
 0x2be   : > { %2337 = sbr.rel (%p2467_p13) target bundleno = 719 (0x2cf), region = 127  ;;  %s2831_s9 = smov (!%p2467_p13), 0  }
 0x2bf   : > { %s2835_s10 = smov (!%p2467_p13), 0  }
 0x2c5 LB: >> { %v2256_v41 = vld [vmem:[%s2829_s7] sm:$0xff]  ;;  %s2258_s11 = sadd.s32 1, %s2833_s9  ;;  %s2250_s10 = sadd.s32 1, %s2837_s10   ;;  %s2837_s10 = sphi %s2835_s10, %s2250_s10   ;;  %s2833_s9 = sphi %s2831_s9, %s2832_s9   ;;  %s2829_s7 = sphi %s2827_s7, %s2263_s7   ;;  %s2825_s6 = sphi %s2823_s6, %s2264_s6  }
 0x2c6   : >> { %2257 = vst [vmem:[%s2825_s6] sm:$0xff] %v2256_v41  ;;  %p2259_p0 = scmp.ge.s32.totalorder %s2258_s11, %s4343_s29  ;;  %p2249_p1 = scmp.ge.s32.totalorder %s2250_s10, %s4343_s29 }
 0x2c8   : >> { %s4405_s11 = smov (%p2259_p0, %s2258_s11), 0  ;;  %2252 = sbr.rel (!%p2249_p1) target bundleno = 709 (0x2c5), region = 133 }
 0x2c9   : >> { %s2468_s8 = sshll.u32 %s4405_s11, 3  ;;  %s2832_s9 = smov %s4405_s11  }
 0x2ca   : >> { %s2263_s7 = scalar_lea.vmem %s2244_s4, %s2468_s8 [#allocation2]   ;;  %s2264_s6 = scalar_lea.vmem %s2246_s5, %s2468_s8  }
 0x2cf PF: > { %p10_p2 = scmp.ge.s32.totalorder %s2880_s16, 5   ;;  %s4397_s12 = smov %s2801_s13 }
 0x2d0   : > { %s4398_s13 = smov %s2888_s19  ;;  %s4399_s14 = smov %s2880_s16 }
 0x2d1   :  { %12 = sbr.rel (!%p10_p2) target bundleno = 2 (0x2), region = 144 }

</bundles_post_ra>
